<compile_context>
chip_gen: v7x
topology: tpu7x:2x2x1
jax: 0.10.0
libtpu: 0.0.40
codegen_flags: <defaults>
</compile_context>

<pallas_src>
import math
import functools

import jax
import jax.numpy as jnp
from jax.experimental import pallas as pl
from jax.experimental.pallas import tpu as pltpu

HIDDEN = 32
NUM_HEAD = 4
HEAD_DIM = HIDDEN // NUM_HEAD
FEED_FORWARD = 64
NUM_LAYERS = 2
MAX_LEN = 350
LN_EPS = 1e-5

VMEM = pltpu.MemorySpace.VMEM
NUM_KERNEL_INPUTS = 25  # x, mask, pos + 12 stacked layer params + 10 head params


# --------------------------- fused Pallas kernel -----------------------------

def _layernorm(z, g, b):
    mu = jnp.mean(z, axis=-1, keepdims=True)
    var = jnp.mean((z - mu) ** 2, axis=-1, keepdims=True)
    return (z - mu) * jax.lax.rsqrt(var + LN_EPS) * g + b


def _fused_forward_kernel(
    x_ref, mask_ref, pos_ref,
    w_in_ref, b_in_ref, w_out_ref, b_out_ref,
    g1_ref, be1_ref, w1_ref, b1_ref, w2_ref, b2_ref, g2_ref, be2_ref,
    fc_w_ref, fc_b_ref, d1_w_ref, d1_b_ref, d2_w_ref, d2_b_ref,
    d3_w_ref, d3_b_ref, ow_ref, ob_ref,
    o_ref, *, B, L):
    H, nH, Dh = HIDDEN, NUM_HEAD, HEAD_DIM

    # embedding scale + positional encoding.
    # TODO(synk): nn.Dropout is identity in eval mode; no kernel work needed.
    x = x_ref[...] * math.sqrt(H) + pos_ref[...][None, :, :]              # (B,L,H)

    # additive key_padding_mask bias — identical for all layers/heads, built once.
    mask_bias = jnp.where(mask_ref[...] > 0.0, 0.0, -1e30)[:, None, :]    # (B,1,L)

    x2d = x.reshape(B * L, H)

    for layer in range(NUM_LAYERS):                    # static unroll (2 layers)
        # ------------------------- self attention ---------------------------
        # qkv projection (q columns pre-scaled by 1/sqrt(Dh) at pack time).
        qkv = jnp.dot(x2d, w_in_ref[layer], preferred_element_type=jnp.float32)
        qkv = (qkv + b_in_ref[layer]).reshape(B, L, 3 * H)
        w_out = w_out_ref[layer]

        attn_out = jnp.zeros((B * L, H), jnp.float32)
        for h in range(nH):                            # static unroll (4 heads)
            q = qkv[:, :, h * Dh:(h + 1) * Dh]                         # (B,L,Dh)
            k = qkv[:, :, H + h * Dh:H + (h + 1) * Dh]
            v = qkv[:, :, 2 * H + h * Dh:2 * H + (h + 1) * Dh]
            s = jnp.einsum("bqd,bkd->bqk", q, k,
                           preferred_element_type=jnp.float32) + mask_bias
            s = s - jnp.max(s, axis=-1, keepdims=True)
            p = jnp.exp(s)
            p = p * pl.reciprocal(jnp.sum(p, axis=-1, keepdims=True), approx=True)
            ho = jnp.einsum("bqk,bkd->bqd", p, v,
                            preferred_element_type=jnp.float32)        # (B,L,Dh)
            # fold head directly into the output projection (no concat/transpose)
            attn_out = attn_out + jnp.dot(
                ho.reshape(B * L, Dh), w_out[h * Dh:(h + 1) * Dh, :],
                preferred_element_type=jnp.float32)
        attn_out = attn_out + b_out_ref[layer]
        x2d = _layernorm(x2d + attn_out, g1_ref[layer], be1_ref[layer])

        # ------------------------- feed forward ------------------------------
        ff = jnp.dot(x2d, w1_ref[layer], preferred_element_type=jnp.float32)
        ff = jnp.maximum(ff + b1_ref[layer], 0.0)
        ff = jnp.dot(ff, w2_ref[layer], preferred_element_type=jnp.float32)
        ff = ff + b2_ref[layer]
        x2d = _layernorm(x2d + ff, g2_ref[layer], be2_ref[layer])

    # ------------------------- pooling + MLP head ----------------------------
    pooled = jnp.mean(x2d.reshape(B, L, H), axis=1)                    # (B, H)
    h = jnp.maximum(jnp.dot(pooled, fc_w_ref[...],
                            preferred_element_type=jnp.float32) + fc_b_ref[...], 0.0)
    h = jnp.maximum(jnp.dot(h, d1_w_ref[...],
                            preferred_element_type=jnp.float32) + d1_b_ref[...], 0.0)
    h = jnp.maximum(jnp.dot(h, d2_w_ref[...],
                            preferred_element_type=jnp.float32) + d2_b_ref[...], 0.0)
    h = jnp.maximum(jnp.dot(h, d3_w_ref[...],
                            preferred_element_type=jnp.float32) + d3_b_ref[...], 0.0)
    logits = jnp.dot(h, ow_ref[...],
                     preferred_element_type=jnp.float32) + ob_ref[...]
    # exact sigmoid so the output is strictly within [0, 1]
    o_ref[...] = 1.0 / (1.0 + jnp.exp(-logits))


# --------------------------- model glue --------------------------------------

@jax.jit
def binary_classifier_forward(packed, query, passage, mask_q, mask_p):
    x = jnp.concatenate([query, passage], axis=1)                      # (B, L, H)
    mask = jnp.concatenate([mask_q, mask_p], axis=1).astype(jnp.float32)  # (B, L)
    B, L, _ = x.shape
    pos = packed["pos_emb"][:L]                                        # (L, H)
    kernel = functools.partial(_fused_forward_kernel, B=B, L=L)
    return pl.pallas_call(
        kernel,
        out_shape=jax.ShapeDtypeStruct((B, 1), jnp.float32),
        in_specs=[pl.BlockSpec(memory_space=VMEM)] * NUM_KERNEL_INPUTS,
        out_specs=pl.BlockSpec(memory_space=VMEM),
    )(x, mask, pos, *packed["flat"])


def pack_params(params):
    """Stack per-layer params along a leading layer axis and fold the attention
    scale into the q projection (done once, outside the kernel)."""
    layers = params["layers"]

    def stack(name):
        return jnp.stack([lp[name] for lp in layers], axis=0)

    w_in = stack("w_in")                        # (NL, H, 3H)
    b_in = stack("b_in")                        # (NL, 1, 3H)
    scale = 1.0 / math.sqrt(HEAD_DIM)
    w_in = w_in.at[:, :, :HIDDEN].multiply(scale)   # fold 1/sqrt(Dh) into q proj
    b_in = b_in.at[:, :, :HIDDEN].multiply(scale)

    flat = (
        w_in, b_in, stack("w_out"), stack("b_out"),
        stack("g1"), stack("be1"), stack("w1"), stack("b1"),
        stack("w2"), stack("b2"), stack("g2"), stack("be2"),
        params["fc_w"], params["fc_b"], params["d1_w"], params["d1_b"],
        params["d2_w"], params["d2_b"], params["d3_w"], params["d3_b"],
        params["out_w"], params["out_b"],
    )
    assert len(flat) + 3 == NUM_KERNEL_INPUTS
    return {"pos_emb": params["pos_emb"], "flat": flat}


# --------------------------- deterministic params ----------------------------

def init_params(key):
    keys = iter(jax.random.split(key, 64))

    def dense(fan_in, fan_out):
        # weights stored as (in, out) so the kernel computes x @ W (== PyTorch x @ W.T)
        return jax.random.normal(next(keys), (fan_in, fan_out), jnp.float32) / math.sqrt(fan_in)

    def zeros(n):
        return jnp.zeros((1, n), jnp.float32)

    params = {
        "pos_emb": jax.random.normal(next(keys), (MAX_LEN, HIDDEN), jnp.float32) * 0.02
    }
    layers = []
    for _ in range(NUM_LAYERS):
        layers.append({
            "w_in": dense(HIDDEN, 3 * HIDDEN), "b_in": zeros(3 * HIDDEN),
            "w_out": dense(HIDDEN, HIDDEN),    "b_out": zeros(HIDDEN),
            "g1": jnp.ones((1, HIDDEN), jnp.float32), "be1": zeros(HIDDEN),
            "w1": dense(HIDDEN, FEED_FORWARD), "b1": zeros(FEED_FORWARD),
            "w2": dense(FEED_FORWARD, HIDDEN), "b2": zeros(HIDDEN),
            "g2": jnp.ones((1, HIDDEN), jnp.float32), "be2": zeros(HIDDEN),
        })
    params["layers"] = layers
    params["fc_w"] = dense(HIDDEN, HIDDEN);                 params["fc_b"] = zeros(HIDDEN)
    params["d1_w"] = dense(HIDDEN, HIDDEN // 4);            params["d1_b"] = zeros(HIDDEN // 4)
    params["d2_w"] = dense(HIDDEN // 4, HIDDEN // 4);       params["d2_b"] = zeros(HIDDEN // 4)
    params["d3_w"] = dense(HIDDEN // 4, HIDDEN // 8);       params["d3_b"] = zeros(HIDDEN // 8)
    params["out_w"] = dense(HIDDEN // 8, 1);                params["out_b"] = zeros(1)
    return params


if __name__ == "__main__":
    B, Lq, Lp = 2, 4, 4
    key = jax.random.PRNGKey(0)
    kq, kp, kparams = jax.random.split(key, 3)

    query = jax.random.normal(kq, (B, Lq, HIDDEN), jnp.float32)
    passage = jax.random.normal(kp, (B, Lp, HIDDEN), jnp.float32)
    mask_q = jnp.ones((B, Lq), jnp.float32)
    mask_p = jnp.array([[1.0, 1.0, 1.0, 1.0],
                        [1.0, 1.0, 1.0, 0.0]], jnp.float32)   # one padded position

    params = init_params(kparams)
    packed = pack_params(params)

    out = binary_classifier_forward(packed, query, passage, mask_q, mask_p)
    out = jax.block_until_ready(out)

    assert out.shape == (B, 1)
    assert bool(jnp.all((out >= 0.0) & (out <= 1.0)))
    print("KERNEL_OK")
</pallas_src>

<mosaic_0001>
module attributes {stable_mosaic.version = 11 : i64} {
  func.func @_fused_forward_kernel(%arg0: memref<2x8x32xf32, #tpu.memory_space<vmem>>, %arg1: memref<2x8xf32, #tpu.memory_space<vmem>>, %arg2: memref<8x32xf32, #tpu.memory_space<vmem>>, %arg3: memref<2x32x96xf32, #tpu.memory_space<vmem>>, %arg4: memref<2x1x96xf32, #tpu.memory_space<vmem>>, %arg5: memref<2x32x32xf32, #tpu.memory_space<vmem>>, %arg6: memref<2x1x32xf32, #tpu.memory_space<vmem>>, %arg7: memref<2x1x32xf32, #tpu.memory_space<vmem>>, %arg8: memref<2x1x32xf32, #tpu.memory_space<vmem>>, %arg9: memref<2x32x64xf32, #tpu.memory_space<vmem>>, %arg10: memref<2x1x64xf32, #tpu.memory_space<vmem>>, %arg11: memref<2x64x32xf32, #tpu.memory_space<vmem>>, %arg12: memref<2x1x32xf32, #tpu.memory_space<vmem>>, %arg13: memref<2x1x32xf32, #tpu.memory_space<vmem>>, %arg14: memref<2x1x32xf32, #tpu.memory_space<vmem>>, %arg15: memref<32x32xf32, #tpu.memory_space<vmem>>, %arg16: memref<1x32xf32, #tpu.memory_space<vmem>>, %arg17: memref<32x8xf32, #tpu.memory_space<vmem>>, %arg18: memref<1x8xf32, #tpu.memory_space<vmem>>, %arg19: memref<8x8xf32, #tpu.memory_space<vmem>>, %arg20: memref<1x8xf32, #tpu.memory_space<vmem>>, %arg21: memref<8x4xf32, #tpu.memory_space<vmem>>, %arg22: memref<1x4xf32, #tpu.memory_space<vmem>>, %arg23: memref<4x1xf32, #tpu.memory_space<vmem>>, %arg24: memref<1x1xf32, #tpu.memory_space<vmem>>, %arg25: memref<2x1xf32, #tpu.memory_space<vmem>>) attributes {dimension_semantics = [], scalar_prefetch = 0 : i64, scratch_operands = 0 : i64, tpu.core_type = #tpu.core_type<tc>} {
    %c0 = arith.constant 0 : index
    %c0_0 = arith.constant 0 : index
    %c0_1 = arith.constant 0 : index
    %0 = vector.load %arg0[%c0, %c0_0, %c0_1] : memref<2x8x32xf32, #tpu.memory_space<vmem>>, vector<2x8x32xf32>
    %cst = arith.constant 5.65685415 : f32
    %1 = vector.broadcast %cst : f32 to vector<2x8x32xf32>
    %2 = arith.mulf %0, %1 : vector<2x8x32xf32>
    %c0_2 = arith.constant 0 : index
    %c0_3 = arith.constant 0 : index
    %3 = vector.load %arg2[%c0_2, %c0_3] : memref<8x32xf32, #tpu.memory_space<vmem>>, vector<8x32xf32>
    %4 = vector.shape_cast %3 : vector<8x32xf32> to vector<1x8x32xf32>
    %5 = vector.broadcast %4 : vector<1x8x32xf32> to vector<2x8x32xf32>
    %6 = arith.addf %2, %5 : vector<2x8x32xf32>
    %c0_4 = arith.constant 0 : index
    %c0_5 = arith.constant 0 : index
    %7 = vector.load %arg1[%c0_4, %c0_5] : memref<2x8xf32, #tpu.memory_space<vmem>>, vector<2x8xf32>
    %cst_6 = arith.constant 0.000000e+00 : f32
    %8 = vector.broadcast %cst_6 : f32 to vector<2x8xf32>
    %9 = arith.cmpf ogt, %7, %8 : vector<2x8xf32>
    %cst_7 = arith.constant 0.000000e+00 : f32
    %cst_8 = arith.constant -1.000000e+30 : f32
    %10 = vector.broadcast %cst_7 : f32 to vector<2x8xf32>
    %11 = vector.broadcast %cst_8 : f32 to vector<2x8xf32>
    %12 = arith.select %9, %10, %11 : vector<2x8xi1>, vector<2x8xf32>
    %13 = vector.shape_cast %12 : vector<2x8xf32> to vector<2x1x8xf32>
    %14 = vector.shape_cast %6 : vector<2x8x32xf32> to vector<16x32xf32>
    %c0_9 = arith.constant 0 : index
    %c0_10 = arith.constant 0 : index
    %c0_11 = arith.constant 0 : index
    %15 = vector.load %arg3[%c0_9, %c0_10, %c0_11] : memref<2x32x96xf32, #tpu.memory_space<vmem>>, vector<1x32x96xf32>
    %16 = vector.shape_cast %15 : vector<1x32x96xf32> to vector<32x96xf32>
    %cst_12 = arith.constant dense<0.000000e+00> : vector<16x96xf32>
    %17 = tpu.matmul %14, %16, %cst_12 {dimension_numbers = #tpu.dot_dimension_numbers<[1], [0], [0], [1], [0, 0, 1, 1], [], []>} : vector<16x32xf32>, vector<32x96xf32>, vector<16x96xf32> -> vector<16x96xf32>
    %c0_13 = arith.constant 0 : index
    %c0_14 = arith.constant 0 : index
    %c0_15 = arith.constant 0 : index
    %18 = vector.load %arg4[%c0_13, %c0_14, %c0_15] : memref<2x1x96xf32, #tpu.memory_space<vmem>>, vector<1x1x96xf32>
    %19 = vector.shape_cast %18 : vector<1x1x96xf32> to vector<1x96xf32>
    %20 = vector.broadcast %19 : vector<1x96xf32> to vector<16x96xf32>
    %21 = arith.addf %17, %20 : vector<16x96xf32>
    %22 = vector.shape_cast %21 : vector<16x96xf32> to vector<2x8x96xf32>
    %c0_16 = arith.constant 0 : index
    %c0_17 = arith.constant 0 : index
    %c0_18 = arith.constant 0 : index
    %23 = vector.load %arg5[%c0_16, %c0_17, %c0_18] : memref<2x32x32xf32, #tpu.memory_space<vmem>>, vector<1x32x32xf32>
    %24 = vector.shape_cast %23 : vector<1x32x32xf32> to vector<32x32xf32>
    %cst_19 = arith.constant 0.000000e+00 : f32
    %25 = vector.broadcast %cst_19 : f32 to vector<16x32xf32>
    %26 = vector.extract_strided_slice %22 {offsets = [0, 0, 0], sizes = [2, 8, 8], strides = [1, 1, 1]} : vector<2x8x96xf32> to vector<2x8x8xf32>
    %27 = vector.extract_strided_slice %22 {offsets = [0, 0, 32], sizes = [2, 8, 8], strides = [1, 1, 1]} : vector<2x8x96xf32> to vector<2x8x8xf32>
    %28 = vector.extract_strided_slice %22 {offsets = [0, 0, 64], sizes = [2, 8, 8], strides = [1, 1, 1]} : vector<2x8x96xf32> to vector<2x8x8xf32>
    "tpu.trace_start"() <{level = 10 : i32, message = "bqd,bkd->bqk"}> : () -> ()
    %cst_20 = arith.constant dense<0.000000e+00> : vector<2x8x8xf32>
    %29 = tpu.matmul %26, %27, %cst_20 {dimension_numbers = #tpu.dot_dimension_numbers<[2], [2], [1], [1], [0, 0, 0, 1, 1, 1], [0], [0]>} : vector<2x8x8xf32>, vector<2x8x8xf32>, vector<2x8x8xf32> -> vector<2x8x8xf32>
    "tpu.trace_stop"() : () -> ()
    %30 = vector.broadcast %13 : vector<2x1x8xf32> to vector<2x8x8xf32>
    %31 = arith.addf %29, %30 : vector<2x8x8xf32>
    %cst_21 = arith.constant dense<0xFF800000> : vector<2x8xf32>
    %32 = vector.multi_reduction <maximumf>, %31, %cst_21 [2] : vector<2x8x8xf32> to vector<2x8xf32>
    %33 = vector.shape_cast %32 : vector<2x8xf32> to vector<2x8x1xf32>
    %34 = vector.broadcast %33 : vector<2x8x1xf32> to vector<2x8x8xf32>
    %35 = arith.subf %31, %34 : vector<2x8x8xf32>
    %36 = math.exp %35 : vector<2x8x8xf32>
    %cst_22 = arith.constant dense<0.000000e+00> : vector<2x8xf32>
    %37 = vector.multi_reduction <add>, %36, %cst_22 [2] : vector<2x8x8xf32> to vector<2x8xf32>
    %38 = vector.shape_cast %37 : vector<2x8xf32> to vector<2x8x1xf32>
    %39 = tpu.reciprocal %38 {approx = true} : vector<2x8x1xf32> -> vector<2x8x1xf32>
    %40 = vector.broadcast %39 : vector<2x8x1xf32> to vector<2x8x8xf32>
    %41 = arith.mulf %36, %40 : vector<2x8x8xf32>
    "tpu.trace_start"() <{level = 10 : i32, message = "bqk,bkd->bqd"}> : () -> ()
    %cst_23 = arith.constant dense<0.000000e+00> : vector<2x8x8xf32>
    %42 = tpu.matmul %41, %28, %cst_23 {dimension_numbers = #tpu.dot_dimension_numbers<[2], [1], [1], [2], [0, 0, 0, 1, 1, 2], [0], [0]>} : vector<2x8x8xf32>, vector<2x8x8xf32>, vector<2x8x8xf32> -> vector<2x8x8xf32>
    "tpu.trace_stop"() : () -> ()
    %43 = vector.shape_cast %42 : vector<2x8x8xf32> to vector<16x8xf32>
    %44 = vector.extract_strided_slice %24 {offsets = [0, 0], sizes = [8, 32], strides = [1, 1]} : vector<32x32xf32> to vector<8x32xf32>
    %cst_24 = arith.constant dense<0.000000e+00> : vector<16x32xf32>
    %45 = tpu.matmul %43, %44, %cst_24 {dimension_numbers = #tpu.dot_dimension_numbers<[1], [0], [0], [1], [0, 0, 1, 1], [], []>} : vector<16x8xf32>, vector<8x32xf32>, vector<16x32xf32> -> vector<16x32xf32>
    %46 = arith.addf %25, %45 : vector<16x32xf32>
    %47 = vector.extract_strided_slice %22 {offsets = [0, 0, 8], sizes = [2, 8, 8], strides = [1, 1, 1]} : vector<2x8x96xf32> to vector<2x8x8xf32>
    %48 = vector.extract_strided_slice %22 {offsets = [0, 0, 40], sizes = [2, 8, 8], strides = [1, 1, 1]} : vector<2x8x96xf32> to vector<2x8x8xf32>
    %49 = vector.extract_strided_slice %22 {offsets = [0, 0, 72], sizes = [2, 8, 8], strides = [1, 1, 1]} : vector<2x8x96xf32> to vector<2x8x8xf32>
    "tpu.trace_start"() <{level = 10 : i32, message = "bqd,bkd->bqk"}> : () -> ()
    %cst_25 = arith.constant dense<0.000000e+00> : vector<2x8x8xf32>
    %50 = tpu.matmul %47, %48, %cst_25 {dimension_numbers = #tpu.dot_dimension_numbers<[2], [2], [1], [1], [0, 0, 0, 1, 1, 1], [0], [0]>} : vector<2x8x8xf32>, vector<2x8x8xf32>, vector<2x8x8xf32> -> vector<2x8x8xf32>
    "tpu.trace_stop"() : () -> ()
    %51 = vector.broadcast %13 : vector<2x1x8xf32> to vector<2x8x8xf32>
    %52 = arith.addf %50, %51 : vector<2x8x8xf32>
    %cst_26 = arith.constant dense<0xFF800000> : vector<2x8xf32>
    %53 = vector.multi_reduction <maximumf>, %52, %cst_26 [2] : vector<2x8x8xf32> to vector<2x8xf32>
    %54 = vector.shape_cast %53 : vector<2x8xf32> to vector<2x8x1xf32>
    %55 = vector.broadcast %54 : vector<2x8x1xf32> to vector<2x8x8xf32>
    %56 = arith.subf %52, %55 : vector<2x8x8xf32>
    %57 = math.exp %56 : vector<2x8x8xf32>
    %cst_27 = arith.constant dense<0.000000e+00> : vector<2x8xf32>
    %58 = vector.multi_reduction <add>, %57, %cst_27 [2] : vector<2x8x8xf32> to vector<2x8xf32>
    %59 = vector.shape_cast %58 : vector<2x8xf32> to vector<2x8x1xf32>
    %60 = tpu.reciprocal %59 {approx = true} : vector<2x8x1xf32> -> vector<2x8x1xf32>
    %61 = vector.broadcast %60 : vector<2x8x1xf32> to vector<2x8x8xf32>
    %62 = arith.mulf %57, %61 : vector<2x8x8xf32>
    "tpu.trace_start"() <{level = 10 : i32, message = "bqk,bkd->bqd"}> : () -> ()
    %cst_28 = arith.constant dense<0.000000e+00> : vector<2x8x8xf32>
    %63 = tpu.matmul %62, %49, %cst_28 {dimension_numbers = #tpu.dot_dimension_numbers<[2], [1], [1], [2], [0, 0, 0, 1, 1, 2], [0], [0]>} : vector<2x8x8xf32>, vector<2x8x8xf32>, vector<2x8x8xf32> -> vector<2x8x8xf32>
    "tpu.trace_stop"() : () -> ()
    %64 = vector.shape_cast %63 : vector<2x8x8xf32> to vector<16x8xf32>
    %65 = vector.extract_strided_slice %24 {offsets = [8, 0], sizes = [8, 32], strides = [1, 1]} : vector<32x32xf32> to vector<8x32xf32>
    %cst_29 = arith.constant dense<0.000000e+00> : vector<16x32xf32>
    %66 = tpu.matmul %64, %65, %cst_29 {dimension_numbers = #tpu.dot_dimension_numbers<[1], [0], [0], [1], [0, 0, 1, 1], [], []>} : vector<16x8xf32>, vector<8x32xf32>, vector<16x32xf32> -> vector<16x32xf32>
    %67 = arith.addf %46, %66 : vector<16x32xf32>
    %68 = vector.extract_strided_slice %22 {offsets = [0, 0, 16], sizes = [2, 8, 8], strides = [1, 1, 1]} : vector<2x8x96xf32> to vector<2x8x8xf32>
    %69 = vector.extract_strided_slice %22 {offsets = [0, 0, 48], sizes = [2, 8, 8], strides = [1, 1, 1]} : vector<2x8x96xf32> to vector<2x8x8xf32>
    %70 = vector.extract_strided_slice %22 {offsets = [0, 0, 80], sizes = [2, 8, 8], strides = [1, 1, 1]} : vector<2x8x96xf32> to vector<2x8x8xf32>
    "tpu.trace_start"() <{level = 10 : i32, message = "bqd,bkd->bqk"}> : () -> ()
    %cst_30 = arith.constant dense<0.000000e+00> : vector<2x8x8xf32>
    %71 = tpu.matmul %68, %69, %cst_30 {dimension_numbers = #tpu.dot_dimension_numbers<[2], [2], [1], [1], [0, 0, 0, 1, 1, 1], [0], [0]>} : vector<2x8x8xf32>, vector<2x8x8xf32>, vector<2x8x8xf32> -> vector<2x8x8xf32>
    "tpu.trace_stop"() : () -> ()
    %72 = vector.broadcast %13 : vector<2x1x8xf32> to vector<2x8x8xf32>
    %73 = arith.addf %71, %72 : vector<2x8x8xf32>
    %cst_31 = arith.constant dense<0xFF800000> : vector<2x8xf32>
    %74 = vector.multi_reduction <maximumf>, %73, %cst_31 [2] : vector<2x8x8xf32> to vector<2x8xf32>
    %75 = vector.shape_cast %74 : vector<2x8xf32> to vector<2x8x1xf32>
    %76 = vector.broadcast %75 : vector<2x8x1xf32> to vector<2x8x8xf32>
    %77 = arith.subf %73, %76 : vector<2x8x8xf32>
    %78 = math.exp %77 : vector<2x8x8xf32>
    %cst_32 = arith.constant dense<0.000000e+00> : vector<2x8xf32>
    %79 = vector.multi_reduction <add>, %78, %cst_32 [2] : vector<2x8x8xf32> to vector<2x8xf32>
    %80 = vector.shape_cast %79 : vector<2x8xf32> to vector<2x8x1xf32>
    %81 = tpu.reciprocal %80 {approx = true} : vector<2x8x1xf32> -> vector<2x8x1xf32>
    %82 = vector.broadcast %81 : vector<2x8x1xf32> to vector<2x8x8xf32>
    %83 = arith.mulf %78, %82 : vector<2x8x8xf32>
    "tpu.trace_start"() <{level = 10 : i32, message = "bqk,bkd->bqd"}> : () -> ()
    %cst_33 = arith.constant dense<0.000000e+00> : vector<2x8x8xf32>
    %84 = tpu.matmul %83, %70, %cst_33 {dimension_numbers = #tpu.dot_dimension_numbers<[2], [1], [1], [2], [0, 0, 0, 1, 1, 2], [0], [0]>} : vector<2x8x8xf32>, vector<2x8x8xf32>, vector<2x8x8xf32> -> vector<2x8x8xf32>
    "tpu.trace_stop"() : () -> ()
    %85 = vector.shape_cast %84 : vector<2x8x8xf32> to vector<16x8xf32>
    %86 = vector.extract_strided_slice %24 {offsets = [16, 0], sizes = [8, 32], strides = [1, 1]} : vector<32x32xf32> to vector<8x32xf32>
    %cst_34 = arith.constant dense<0.000000e+00> : vector<16x32xf32>
    %87 = tpu.matmul %85, %86, %cst_34 {dimension_numbers = #tpu.dot_dimension_numbers<[1], [0], [0], [1], [0, 0, 1, 1], [], []>} : vector<16x8xf32>, vector<8x32xf32>, vector<16x32xf32> -> vector<16x32xf32>
    %88 = arith.addf %67, %87 : vector<16x32xf32>
    %89 = vector.extract_strided_slice %22 {offsets = [0, 0, 24], sizes = [2, 8, 8], strides = [1, 1, 1]} : vector<2x8x96xf32> to vector<2x8x8xf32>
    %90 = vector.extract_strided_slice %22 {offsets = [0, 0, 56], sizes = [2, 8, 8], strides = [1, 1, 1]} : vector<2x8x96xf32> to vector<2x8x8xf32>
    %91 = vector.extract_strided_slice %22 {offsets = [0, 0, 88], sizes = [2, 8, 8], strides = [1, 1, 1]} : vector<2x8x96xf32> to vector<2x8x8xf32>
    "tpu.trace_start"() <{level = 10 : i32, message = "bqd,bkd->bqk"}> : () -> ()
    %cst_35 = arith.constant dense<0.000000e+00> : vector<2x8x8xf32>
    %92 = tpu.matmul %89, %90, %cst_35 {dimension_numbers = #tpu.dot_dimension_numbers<[2], [2], [1], [1], [0, 0, 0, 1, 1, 1], [0], [0]>} : vector<2x8x8xf32>, vector<2x8x8xf32>, vector<2x8x8xf32> -> vector<2x8x8xf32>
    "tpu.trace_stop"() : () -> ()
    %93 = vector.broadcast %13 : vector<2x1x8xf32> to vector<2x8x8xf32>
    %94 = arith.addf %92, %93 : vector<2x8x8xf32>
    %cst_36 = arith.constant dense<0xFF800000> : vector<2x8xf32>
    %95 = vector.multi_reduction <maximumf>, %94, %cst_36 [2] : vector<2x8x8xf32> to vector<2x8xf32>
    %96 = vector.shape_cast %95 : vector<2x8xf32> to vector<2x8x1xf32>
    %97 = vector.broadcast %96 : vector<2x8x1xf32> to vector<2x8x8xf32>
    %98 = arith.subf %94, %97 : vector<2x8x8xf32>
    %99 = math.exp %98 : vector<2x8x8xf32>
    %cst_37 = arith.constant dense<0.000000e+00> : vector<2x8xf32>
    %100 = vector.multi_reduction <add>, %99, %cst_37 [2] : vector<2x8x8xf32> to vector<2x8xf32>
    %101 = vector.shape_cast %100 : vector<2x8xf32> to vector<2x8x1xf32>
    %102 = tpu.reciprocal %101 {approx = true} : vector<2x8x1xf32> -> vector<2x8x1xf32>
    %103 = vector.broadcast %102 : vector<2x8x1xf32> to vector<2x8x8xf32>
    %104 = arith.mulf %99, %103 : vector<2x8x8xf32>
    "tpu.trace_start"() <{level = 10 : i32, message = "bqk,bkd->bqd"}> : () -> ()
    %cst_38 = arith.constant dense<0.000000e+00> : vector<2x8x8xf32>
    %105 = tpu.matmul %104, %91, %cst_38 {dimension_numbers = #tpu.dot_dimension_numbers<[2], [1], [1], [2], [0, 0, 0, 1, 1, 2], [0], [0]>} : vector<2x8x8xf32>, vector<2x8x8xf32>, vector<2x8x8xf32> -> vector<2x8x8xf32>
    "tpu.trace_stop"() : () -> ()
    %106 = vector.shape_cast %105 : vector<2x8x8xf32> to vector<16x8xf32>
    %107 = vector.extract_strided_slice %24 {offsets = [24, 0], sizes = [8, 32], strides = [1, 1]} : vector<32x32xf32> to vector<8x32xf32>
    %cst_39 = arith.constant dense<0.000000e+00> : vector<16x32xf32>
    %108 = tpu.matmul %106, %107, %cst_39 {dimension_numbers = #tpu.dot_dimension_numbers<[1], [0], [0], [1], [0, 0, 1, 1], [], []>} : vector<16x8xf32>, vector<8x32xf32>, vector<16x32xf32> -> vector<16x32xf32>
    %109 = arith.addf %88, %108 : vector<16x32xf32>
    %c0_40 = arith.constant 0 : index
    %c0_41 = arith.constant 0 : index
    %c0_42 = arith.constant 0 : index
    %110 = vector.load %arg6[%c0_40, %c0_41, %c0_42] : memref<2x1x32xf32, #tpu.memory_space<vmem>>, vector<1x1x32xf32>
    %111 = vector.shape_cast %110 : vector<1x1x32xf32> to vector<1x32xf32>
    %112 = vector.broadcast %111 : vector<1x32xf32> to vector<16x32xf32>
    %113 = arith.addf %109, %112 : vector<16x32xf32>
    %114 = arith.addf %14, %113 : vector<16x32xf32>
    %c0_43 = arith.constant 0 : index
    %c0_44 = arith.constant 0 : index
    %c0_45 = arith.constant 0 : index
    %115 = vector.load %arg7[%c0_43, %c0_44, %c0_45] : memref<2x1x32xf32, #tpu.memory_space<vmem>>, vector<1x1x32xf32>
    %116 = vector.shape_cast %115 : vector<1x1x32xf32> to vector<1x32xf32>
    %c0_46 = arith.constant 0 : index
    %c0_47 = arith.constant 0 : index
    %c0_48 = arith.constant 0 : index
    %117 = vector.load %arg8[%c0_46, %c0_47, %c0_48] : memref<2x1x32xf32, #tpu.memory_space<vmem>>, vector<1x1x32xf32>
    %118 = vector.shape_cast %117 : vector<1x1x32xf32> to vector<1x32xf32>
    %cst_49 = arith.constant dense<0.000000e+00> : vector<16xf32>
    %119 = vector.multi_reduction <add>, %114, %cst_49 [1] : vector<16x32xf32> to vector<16xf32>
    %120 = vector.shape_cast %119 : vector<16xf32> to vector<16x1xf32>
    %cst_50 = arith.constant 3.200000e+01 : f32
    %121 = vector.broadcast %cst_50 : f32 to vector<16x1xf32>
    %122 = arith.divf %120, %121 : vector<16x1xf32>
    %123 = vector.broadcast %122 : vector<16x1xf32> to vector<16x32xf32>
    %124 = arith.subf %114, %123 : vector<16x32xf32>
    %125 = arith.mulf %124, %124 : vector<16x32xf32>
    %cst_51 = arith.constant dense<0.000000e+00> : vector<16xf32>
    %126 = vector.multi_reduction <add>, %125, %cst_51 [1] : vector<16x32xf32> to vector<16xf32>
    %127 = vector.shape_cast %126 : vector<16xf32> to vector<16x1xf32>
    %cst_52 = arith.constant 3.200000e+01 : f32
    %128 = vector.broadcast %cst_52 : f32 to vector<16x1xf32>
    %129 = arith.divf %127, %128 : vector<16x1xf32>
    %130 = vector.broadcast %122 : vector<16x1xf32> to vector<16x32xf32>
    %131 = arith.subf %114, %130 : vector<16x32xf32>
    %cst_53 = arith.constant 9.99999974E-6 : f32
    %132 = vector.broadcast %cst_53 : f32 to vector<16x1xf32>
    %133 = arith.addf %129, %132 : vector<16x1xf32>
    %134 = math.rsqrt %133 : vector<16x1xf32>
    %135 = vector.broadcast %134 : vector<16x1xf32> to vector<16x32xf32>
    %136 = arith.mulf %131, %135 : vector<16x32xf32>
    %137 = vector.broadcast %116 : vector<1x32xf32> to vector<16x32xf32>
    %138 = arith.mulf %136, %137 : vector<16x32xf32>
    %139 = vector.broadcast %118 : vector<1x32xf32> to vector<16x32xf32>
    %140 = arith.addf %138, %139 : vector<16x32xf32>
    %c0_54 = arith.constant 0 : index
    %c0_55 = arith.constant 0 : index
    %c0_56 = arith.constant 0 : index
    %141 = vector.load %arg9[%c0_54, %c0_55, %c0_56] : memref<2x32x64xf32, #tpu.memory_space<vmem>>, vector<1x32x64xf32>
    %142 = vector.shape_cast %141 : vector<1x32x64xf32> to vector<32x64xf32>
    %cst_57 = arith.constant dense<0.000000e+00> : vector<16x64xf32>
    %143 = tpu.matmul %140, %142, %cst_57 {dimension_numbers = #tpu.dot_dimension_numbers<[1], [0], [0], [1], [0, 0, 1, 1], [], []>} : vector<16x32xf32>, vector<32x64xf32>, vector<16x64xf32> -> vector<16x64xf32>
    %c0_58 = arith.constant 0 : index
    %c0_59 = arith.constant 0 : index
    %c0_60 = arith.constant 0 : index
    %144 = vector.load %arg10[%c0_58, %c0_59, %c0_60] : memref<2x1x64xf32, #tpu.memory_space<vmem>>, vector<1x1x64xf32>
    %145 = vector.shape_cast %144 : vector<1x1x64xf32> to vector<1x64xf32>
    %146 = vector.broadcast %145 : vector<1x64xf32> to vector<16x64xf32>
    %147 = arith.addf %143, %146 : vector<16x64xf32>
    %cst_61 = arith.constant 0.000000e+00 : f32
    %148 = vector.broadcast %cst_61 : f32 to vector<16x64xf32>
    %149 = arith.maximumf %147, %148 : vector<16x64xf32>
    %c0_62 = arith.constant 0 : index
    %c0_63 = arith.constant 0 : index
    %c0_64 = arith.constant 0 : index
    %150 = vector.load %arg11[%c0_62, %c0_63, %c0_64] : memref<2x64x32xf32, #tpu.memory_space<vmem>>, vector<1x64x32xf32>
    %151 = vector.shape_cast %150 : vector<1x64x32xf32> to vector<64x32xf32>
    %cst_65 = arith.constant dense<0.000000e+00> : vector<16x32xf32>
    %152 = tpu.matmul %149, %151, %cst_65 {dimension_numbers = #tpu.dot_dimension_numbers<[1], [0], [0], [1], [0, 0, 1, 1], [], []>} : vector<16x64xf32>, vector<64x32xf32>, vector<16x32xf32> -> vector<16x32xf32>
    %c0_66 = arith.constant 0 : index
    %c0_67 = arith.constant 0 : index
    %c0_68 = arith.constant 0 : index
    %153 = vector.load %arg12[%c0_66, %c0_67, %c0_68] : memref<2x1x32xf32, #tpu.memory_space<vmem>>, vector<1x1x32xf32>
    %154 = vector.shape_cast %153 : vector<1x1x32xf32> to vector<1x32xf32>
    %155 = vector.broadcast %154 : vector<1x32xf32> to vector<16x32xf32>
    %156 = arith.addf %152, %155 : vector<16x32xf32>
    %157 = arith.addf %140, %156 : vector<16x32xf32>
    %c0_69 = arith.constant 0 : index
    %c0_70 = arith.constant 0 : index
    %c0_71 = arith.constant 0 : index
    %158 = vector.load %arg13[%c0_69, %c0_70, %c0_71] : memref<2x1x32xf32, #tpu.memory_space<vmem>>, vector<1x1x32xf32>
    %159 = vector.shape_cast %158 : vector<1x1x32xf32> to vector<1x32xf32>
    %c0_72 = arith.constant 0 : index
    %c0_73 = arith.constant 0 : index
    %c0_74 = arith.constant 0 : index
    %160 = vector.load %arg14[%c0_72, %c0_73, %c0_74] : memref<2x1x32xf32, #tpu.memory_space<vmem>>, vector<1x1x32xf32>
    %161 = vector.shape_cast %160 : vector<1x1x32xf32> to vector<1x32xf32>
    %cst_75 = arith.constant dense<0.000000e+00> : vector<16xf32>
    %162 = vector.multi_reduction <add>, %157, %cst_75 [1] : vector<16x32xf32> to vector<16xf32>
    %163 = vector.shape_cast %162 : vector<16xf32> to vector<16x1xf32>
    %cst_76 = arith.constant 3.200000e+01 : f32
    %164 = vector.broadcast %cst_76 : f32 to vector<16x1xf32>
    %165 = arith.divf %163, %164 : vector<16x1xf32>
    %166 = vector.broadcast %165 : vector<16x1xf32> to vector<16x32xf32>
    %167 = arith.subf %157, %166 : vector<16x32xf32>
    %168 = arith.mulf %167, %167 : vector<16x32xf32>
    %cst_77 = arith.constant dense<0.000000e+00> : vector<16xf32>
    %169 = vector.multi_reduction <add>, %168, %cst_77 [1] : vector<16x32xf32> to vector<16xf32>
    %170 = vector.shape_cast %169 : vector<16xf32> to vector<16x1xf32>
    %cst_78 = arith.constant 3.200000e+01 : f32
    %171 = vector.broadcast %cst_78 : f32 to vector<16x1xf32>
    %172 = arith.divf %170, %171 : vector<16x1xf32>
    %173 = vector.broadcast %165 : vector<16x1xf32> to vector<16x32xf32>
    %174 = arith.subf %157, %173 : vector<16x32xf32>
    %cst_79 = arith.constant 9.99999974E-6 : f32
    %175 = vector.broadcast %cst_79 : f32 to vector<16x1xf32>
    %176 = arith.addf %172, %175 : vector<16x1xf32>
    %177 = math.rsqrt %176 : vector<16x1xf32>
    %178 = vector.broadcast %177 : vector<16x1xf32> to vector<16x32xf32>
    %179 = arith.mulf %174, %178 : vector<16x32xf32>
    %180 = vector.broadcast %159 : vector<1x32xf32> to vector<16x32xf32>
    %181 = arith.mulf %179, %180 : vector<16x32xf32>
    %182 = vector.broadcast %161 : vector<1x32xf32> to vector<16x32xf32>
    %183 = arith.addf %181, %182 : vector<16x32xf32>
    %c1 = arith.constant 1 : index
    %c0_80 = arith.constant 0 : index
    %c0_81 = arith.constant 0 : index
    %184 = vector.load %arg3[%c1, %c0_80, %c0_81] : memref<2x32x96xf32, #tpu.memory_space<vmem>>, vector<1x32x96xf32>
    %185 = vector.shape_cast %184 : vector<1x32x96xf32> to vector<32x96xf32>
    %cst_82 = arith.constant dense<0.000000e+00> : vector<16x96xf32>
    %186 = tpu.matmul %183, %185, %cst_82 {dimension_numbers = #tpu.dot_dimension_numbers<[1], [0], [0], [1], [0, 0, 1, 1], [], []>} : vector<16x32xf32>, vector<32x96xf32>, vector<16x96xf32> -> vector<16x96xf32>
    %c1_83 = arith.constant 1 : index
    %c0_84 = arith.constant 0 : index
    %c0_85 = arith.constant 0 : index
    %187 = vector.load %arg4[%c1_83, %c0_84, %c0_85] : memref<2x1x96xf32, #tpu.memory_space<vmem>>, vector<1x1x96xf32>
    %188 = vector.shape_cast %187 : vector<1x1x96xf32> to vector<1x96xf32>
    %189 = vector.broadcast %188 : vector<1x96xf32> to vector<16x96xf32>
    %190 = arith.addf %186, %189 : vector<16x96xf32>
    %191 = vector.shape_cast %190 : vector<16x96xf32> to vector<2x8x96xf32>
    %c1_86 = arith.constant 1 : index
    %c0_87 = arith.constant 0 : index
    %c0_88 = arith.constant 0 : index
    %192 = vector.load %arg5[%c1_86, %c0_87, %c0_88] : memref<2x32x32xf32, #tpu.memory_space<vmem>>, vector<1x32x32xf32>
    %193 = vector.shape_cast %192 : vector<1x32x32xf32> to vector<32x32xf32>
    %cst_89 = arith.constant 0.000000e+00 : f32
    %194 = vector.broadcast %cst_89 : f32 to vector<16x32xf32>
    %195 = vector.extract_strided_slice %191 {offsets = [0, 0, 0], sizes = [2, 8, 8], strides = [1, 1, 1]} : vector<2x8x96xf32> to vector<2x8x8xf32>
    %196 = vector.extract_strided_slice %191 {offsets = [0, 0, 32], sizes = [2, 8, 8], strides = [1, 1, 1]} : vector<2x8x96xf32> to vector<2x8x8xf32>
    %197 = vector.extract_strided_slice %191 {offsets = [0, 0, 64], sizes = [2, 8, 8], strides = [1, 1, 1]} : vector<2x8x96xf32> to vector<2x8x8xf32>
    "tpu.trace_start"() <{level = 10 : i32, message = "bqd,bkd->bqk"}> : () -> ()
    %cst_90 = arith.constant dense<0.000000e+00> : vector<2x8x8xf32>
    %198 = tpu.matmul %195, %196, %cst_90 {dimension_numbers = #tpu.dot_dimension_numbers<[2], [2], [1], [1], [0, 0, 0, 1, 1, 1], [0], [0]>} : vector<2x8x8xf32>, vector<2x8x8xf32>, vector<2x8x8xf32> -> vector<2x8x8xf32>
    "tpu.trace_stop"() : () -> ()
    %199 = vector.broadcast %13 : vector<2x1x8xf32> to vector<2x8x8xf32>
    %200 = arith.addf %198, %199 : vector<2x8x8xf32>
    %cst_91 = arith.constant dense<0xFF800000> : vector<2x8xf32>
    %201 = vector.multi_reduction <maximumf>, %200, %cst_91 [2] : vector<2x8x8xf32> to vector<2x8xf32>
    %202 = vector.shape_cast %201 : vector<2x8xf32> to vector<2x8x1xf32>
    %203 = vector.broadcast %202 : vector<2x8x1xf32> to vector<2x8x8xf32>
    %204 = arith.subf %200, %203 : vector<2x8x8xf32>
    %205 = math.exp %204 : vector<2x8x8xf32>
    %cst_92 = arith.constant dense<0.000000e+00> : vector<2x8xf32>
    %206 = vector.multi_reduction <add>, %205, %cst_92 [2] : vector<2x8x8xf32> to vector<2x8xf32>
    %207 = vector.shape_cast %206 : vector<2x8xf32> to vector<2x8x1xf32>
    %208 = tpu.reciprocal %207 {approx = true} : vector<2x8x1xf32> -> vector<2x8x1xf32>
    %209 = vector.broadcast %208 : vector<2x8x1xf32> to vector<2x8x8xf32>
    %210 = arith.mulf %205, %209 : vector<2x8x8xf32>
    "tpu.trace_start"() <{level = 10 : i32, message = "bqk,bkd->bqd"}> : () -> ()
    %cst_93 = arith.constant dense<0.000000e+00> : vector<2x8x8xf32>
    %211 = tpu.matmul %210, %197, %cst_93 {dimension_numbers = #tpu.dot_dimension_numbers<[2], [1], [1], [2], [0, 0, 0, 1, 1, 2], [0], [0]>} : vector<2x8x8xf32>, vector<2x8x8xf32>, vector<2x8x8xf32> -> vector<2x8x8xf32>
    "tpu.trace_stop"() : () -> ()
    %212 = vector.shape_cast %211 : vector<2x8x8xf32> to vector<16x8xf32>
    %213 = vector.extract_strided_slice %193 {offsets = [0, 0], sizes = [8, 32], strides = [1, 1]} : vector<32x32xf32> to vector<8x32xf32>
    %cst_94 = arith.constant dense<0.000000e+00> : vector<16x32xf32>
    %214 = tpu.matmul %212, %213, %cst_94 {dimension_numbers = #tpu.dot_dimension_numbers<[1], [0], [0], [1], [0, 0, 1, 1], [], []>} : vector<16x8xf32>, vector<8x32xf32>, vector<16x32xf32> -> vector<16x32xf32>
    %215 = arith.addf %194, %214 : vector<16x32xf32>
    %216 = vector.extract_strided_slice %191 {offsets = [0, 0, 8], sizes = [2, 8, 8], strides = [1, 1, 1]} : vector<2x8x96xf32> to vector<2x8x8xf32>
    %217 = vector.extract_strided_slice %191 {offsets = [0, 0, 40], sizes = [2, 8, 8], strides = [1, 1, 1]} : vector<2x8x96xf32> to vector<2x8x8xf32>
    %218 = vector.extract_strided_slice %191 {offsets = [0, 0, 72], sizes = [2, 8, 8], strides = [1, 1, 1]} : vector<2x8x96xf32> to vector<2x8x8xf32>
    "tpu.trace_start"() <{level = 10 : i32, message = "bqd,bkd->bqk"}> : () -> ()
    %cst_95 = arith.constant dense<0.000000e+00> : vector<2x8x8xf32>
    %219 = tpu.matmul %216, %217, %cst_95 {dimension_numbers = #tpu.dot_dimension_numbers<[2], [2], [1], [1], [0, 0, 0, 1, 1, 1], [0], [0]>} : vector<2x8x8xf32>, vector<2x8x8xf32>, vector<2x8x8xf32> -> vector<2x8x8xf32>
    "tpu.trace_stop"() : () -> ()
    %220 = vector.broadcast %13 : vector<2x1x8xf32> to vector<2x8x8xf32>
    %221 = arith.addf %219, %220 : vector<2x8x8xf32>
    %cst_96 = arith.constant dense<0xFF800000> : vector<2x8xf32>
    %222 = vector.multi_reduction <maximumf>, %221, %cst_96 [2] : vector<2x8x8xf32> to vector<2x8xf32>
    %223 = vector.shape_cast %222 : vector<2x8xf32> to vector<2x8x1xf32>
    %224 = vector.broadcast %223 : vector<2x8x1xf32> to vector<2x8x8xf32>
    %225 = arith.subf %221, %224 : vector<2x8x8xf32>
    %226 = math.exp %225 : vector<2x8x8xf32>
    %cst_97 = arith.constant dense<0.000000e+00> : vector<2x8xf32>
    %227 = vector.multi_reduction <add>, %226, %cst_97 [2] : vector<2x8x8xf32> to vector<2x8xf32>
    %228 = vector.shape_cast %227 : vector<2x8xf32> to vector<2x8x1xf32>
    %229 = tpu.reciprocal %228 {approx = true} : vector<2x8x1xf32> -> vector<2x8x1xf32>
    %230 = vector.broadcast %229 : vector<2x8x1xf32> to vector<2x8x8xf32>
    %231 = arith.mulf %226, %230 : vector<2x8x8xf32>
    "tpu.trace_start"() <{level = 10 : i32, message = "bqk,bkd->bqd"}> : () -> ()
    %cst_98 = arith.constant dense<0.000000e+00> : vector<2x8x8xf32>
    %232 = tpu.matmul %231, %218, %cst_98 {dimension_numbers = #tpu.dot_dimension_numbers<[2], [1], [1], [2], [0, 0, 0, 1, 1, 2], [0], [0]>} : vector<2x8x8xf32>, vector<2x8x8xf32>, vector<2x8x8xf32> -> vector<2x8x8xf32>
    "tpu.trace_stop"() : () -> ()
    %233 = vector.shape_cast %232 : vector<2x8x8xf32> to vector<16x8xf32>
    %234 = vector.extract_strided_slice %193 {offsets = [8, 0], sizes = [8, 32], strides = [1, 1]} : vector<32x32xf32> to vector<8x32xf32>
    %cst_99 = arith.constant dense<0.000000e+00> : vector<16x32xf32>
    %235 = tpu.matmul %233, %234, %cst_99 {dimension_numbers = #tpu.dot_dimension_numbers<[1], [0], [0], [1], [0, 0, 1, 1], [], []>} : vector<16x8xf32>, vector<8x32xf32>, vector<16x32xf32> -> vector<16x32xf32>
    %236 = arith.addf %215, %235 : vector<16x32xf32>
    %237 = vector.extract_strided_slice %191 {offsets = [0, 0, 16], sizes = [2, 8, 8], strides = [1, 1, 1]} : vector<2x8x96xf32> to vector<2x8x8xf32>
    %238 = vector.extract_strided_slice %191 {offsets = [0, 0, 48], sizes = [2, 8, 8], strides = [1, 1, 1]} : vector<2x8x96xf32> to vector<2x8x8xf32>
    %239 = vector.extract_strided_slice %191 {offsets = [0, 0, 80], sizes = [2, 8, 8], strides = [1, 1, 1]} : vector<2x8x96xf32> to vector<2x8x8xf32>
    "tpu.trace_start"() <{level = 10 : i32, message = "bqd,bkd->bqk"}> : () -> ()
    %cst_100 = arith.constant dense<0.000000e+00> : vector<2x8x8xf32>
    %240 = tpu.matmul %237, %238, %cst_100 {dimension_numbers = #tpu.dot_dimension_numbers<[2], [2], [1], [1], [0, 0, 0, 1, 1, 1], [0], [0]>} : vector<2x8x8xf32>, vector<2x8x8xf32>, vector<2x8x8xf32> -> vector<2x8x8xf32>
    "tpu.trace_stop"() : () -> ()
    %241 = vector.broadcast %13 : vector<2x1x8xf32> to vector<2x8x8xf32>
    %242 = arith.addf %240, %241 : vector<2x8x8xf32>
    %cst_101 = arith.constant dense<0xFF800000> : vector<2x8xf32>
    %243 = vector.multi_reduction <maximumf>, %242, %cst_101 [2] : vector<2x8x8xf32> to vector<2x8xf32>
    %244 = vector.shape_cast %243 : vector<2x8xf32> to vector<2x8x1xf32>
    %245 = vector.broadcast %244 : vector<2x8x1xf32> to vector<2x8x8xf32>
    %246 = arith.subf %242, %245 : vector<2x8x8xf32>
    %247 = math.exp %246 : vector<2x8x8xf32>
    %cst_102 = arith.constant dense<0.000000e+00> : vector<2x8xf32>
    %248 = vector.multi_reduction <add>, %247, %cst_102 [2] : vector<2x8x8xf32> to vector<2x8xf32>
    %249 = vector.shape_cast %248 : vector<2x8xf32> to vector<2x8x1xf32>
    %250 = tpu.reciprocal %249 {approx = true} : vector<2x8x1xf32> -> vector<2x8x1xf32>
    %251 = vector.broadcast %250 : vector<2x8x1xf32> to vector<2x8x8xf32>
    %252 = arith.mulf %247, %251 : vector<2x8x8xf32>
    "tpu.trace_start"() <{level = 10 : i32, message = "bqk,bkd->bqd"}> : () -> ()
    %cst_103 = arith.constant dense<0.000000e+00> : vector<2x8x8xf32>
    %253 = tpu.matmul %252, %239, %cst_103 {dimension_numbers = #tpu.dot_dimension_numbers<[2], [1], [1], [2], [0, 0, 0, 1, 1, 2], [0], [0]>} : vector<2x8x8xf32>, vector<2x8x8xf32>, vector<2x8x8xf32> -> vector<2x8x8xf32>
    "tpu.trace_stop"() : () -> ()
    %254 = vector.shape_cast %253 : vector<2x8x8xf32> to vector<16x8xf32>
    %255 = vector.extract_strided_slice %193 {offsets = [16, 0], sizes = [8, 32], strides = [1, 1]} : vector<32x32xf32> to vector<8x32xf32>
    %cst_104 = arith.constant dense<0.000000e+00> : vector<16x32xf32>
    %256 = tpu.matmul %254, %255, %cst_104 {dimension_numbers = #tpu.dot_dimension_numbers<[1], [0], [0], [1], [0, 0, 1, 1], [], []>} : vector<16x8xf32>, vector<8x32xf32>, vector<16x32xf32> -> vector<16x32xf32>
    %257 = arith.addf %236, %256 : vector<16x32xf32>
    %258 = vector.extract_strided_slice %191 {offsets = [0, 0, 24], sizes = [2, 8, 8], strides = [1, 1, 1]} : vector<2x8x96xf32> to vector<2x8x8xf32>
    %259 = vector.extract_strided_slice %191 {offsets = [0, 0, 56], sizes = [2, 8, 8], strides = [1, 1, 1]} : vector<2x8x96xf32> to vector<2x8x8xf32>
    %260 = vector.extract_strided_slice %191 {offsets = [0, 0, 88], sizes = [2, 8, 8], strides = [1, 1, 1]} : vector<2x8x96xf32> to vector<2x8x8xf32>
    "tpu.trace_start"() <{level = 10 : i32, message = "bqd,bkd->bqk"}> : () -> ()
    %cst_105 = arith.constant dense<0.000000e+00> : vector<2x8x8xf32>
    %261 = tpu.matmul %258, %259, %cst_105 {dimension_numbers = #tpu.dot_dimension_numbers<[2], [2], [1], [1], [0, 0, 0, 1, 1, 1], [0], [0]>} : vector<2x8x8xf32>, vector<2x8x8xf32>, vector<2x8x8xf32> -> vector<2x8x8xf32>
    "tpu.trace_stop"() : () -> ()
    %262 = vector.broadcast %13 : vector<2x1x8xf32> to vector<2x8x8xf32>
    %263 = arith.addf %261, %262 : vector<2x8x8xf32>
    %cst_106 = arith.constant dense<0xFF800000> : vector<2x8xf32>
    %264 = vector.multi_reduction <maximumf>, %263, %cst_106 [2] : vector<2x8x8xf32> to vector<2x8xf32>
    %265 = vector.shape_cast %264 : vector<2x8xf32> to vector<2x8x1xf32>
    %266 = vector.broadcast %265 : vector<2x8x1xf32> to vector<2x8x8xf32>
    %267 = arith.subf %263, %266 : vector<2x8x8xf32>
    %268 = math.exp %267 : vector<2x8x8xf32>
    %cst_107 = arith.constant dense<0.000000e+00> : vector<2x8xf32>
    %269 = vector.multi_reduction <add>, %268, %cst_107 [2] : vector<2x8x8xf32> to vector<2x8xf32>
    %270 = vector.shape_cast %269 : vector<2x8xf32> to vector<2x8x1xf32>
    %271 = tpu.reciprocal %270 {approx = true} : vector<2x8x1xf32> -> vector<2x8x1xf32>
    %272 = vector.broadcast %271 : vector<2x8x1xf32> to vector<2x8x8xf32>
    %273 = arith.mulf %268, %272 : vector<2x8x8xf32>
    "tpu.trace_start"() <{level = 10 : i32, message = "bqk,bkd->bqd"}> : () -> ()
    %cst_108 = arith.constant dense<0.000000e+00> : vector<2x8x8xf32>
    %274 = tpu.matmul %273, %260, %cst_108 {dimension_numbers = #tpu.dot_dimension_numbers<[2], [1], [1], [2], [0, 0, 0, 1, 1, 2], [0], [0]>} : vector<2x8x8xf32>, vector<2x8x8xf32>, vector<2x8x8xf32> -> vector<2x8x8xf32>
    "tpu.trace_stop"() : () -> ()
    %275 = vector.shape_cast %274 : vector<2x8x8xf32> to vector<16x8xf32>
    %276 = vector.extract_strided_slice %193 {offsets = [24, 0], sizes = [8, 32], strides = [1, 1]} : vector<32x32xf32> to vector<8x32xf32>
    %cst_109 = arith.constant dense<0.000000e+00> : vector<16x32xf32>
    %277 = tpu.matmul %275, %276, %cst_109 {dimension_numbers = #tpu.dot_dimension_numbers<[1], [0], [0], [1], [0, 0, 1, 1], [], []>} : vector<16x8xf32>, vector<8x32xf32>, vector<16x32xf32> -> vector<16x32xf32>
    %278 = arith.addf %257, %277 : vector<16x32xf32>
    %c1_110 = arith.constant 1 : index
    %c0_111 = arith.constant 0 : index
    %c0_112 = arith.constant 0 : index
    %279 = vector.load %arg6[%c1_110, %c0_111, %c0_112] : memref<2x1x32xf32, #tpu.memory_space<vmem>>, vector<1x1x32xf32>
    %280 = vector.shape_cast %279 : vector<1x1x32xf32> to vector<1x32xf32>
    %281 = vector.broadcast %280 : vector<1x32xf32> to vector<16x32xf32>
    %282 = arith.addf %278, %281 : vector<16x32xf32>
    %283 = arith.addf %183, %282 : vector<16x32xf32>
    %c1_113 = arith.constant 1 : index
    %c0_114 = arith.constant 0 : index
    %c0_115 = arith.constant 0 : index
    %284 = vector.load %arg7[%c1_113, %c0_114, %c0_115] : memref<2x1x32xf32, #tpu.memory_space<vmem>>, vector<1x1x32xf32>
    %285 = vector.shape_cast %284 : vector<1x1x32xf32> to vector<1x32xf32>
    %c1_116 = arith.constant 1 : index
    %c0_117 = arith.constant 0 : index
    %c0_118 = arith.constant 0 : index
    %286 = vector.load %arg8[%c1_116, %c0_117, %c0_118] : memref<2x1x32xf32, #tpu.memory_space<vmem>>, vector<1x1x32xf32>
    %287 = vector.shape_cast %286 : vector<1x1x32xf32> to vector<1x32xf32>
    %cst_119 = arith.constant dense<0.000000e+00> : vector<16xf32>
    %288 = vector.multi_reduction <add>, %283, %cst_119 [1] : vector<16x32xf32> to vector<16xf32>
    %289 = vector.shape_cast %288 : vector<16xf32> to vector<16x1xf32>
    %cst_120 = arith.constant 3.200000e+01 : f32
    %290 = vector.broadcast %cst_120 : f32 to vector<16x1xf32>
    %291 = arith.divf %289, %290 : vector<16x1xf32>
    %292 = vector.broadcast %291 : vector<16x1xf32> to vector<16x32xf32>
    %293 = arith.subf %283, %292 : vector<16x32xf32>
    %294 = arith.mulf %293, %293 : vector<16x32xf32>
    %cst_121 = arith.constant dense<0.000000e+00> : vector<16xf32>
    %295 = vector.multi_reduction <add>, %294, %cst_121 [1] : vector<16x32xf32> to vector<16xf32>
    %296 = vector.shape_cast %295 : vector<16xf32> to vector<16x1xf32>
    %cst_122 = arith.constant 3.200000e+01 : f32
    %297 = vector.broadcast %cst_122 : f32 to vector<16x1xf32>
    %298 = arith.divf %296, %297 : vector<16x1xf32>
    %299 = vector.broadcast %291 : vector<16x1xf32> to vector<16x32xf32>
    %300 = arith.subf %283, %299 : vector<16x32xf32>
    %cst_123 = arith.constant 9.99999974E-6 : f32
    %301 = vector.broadcast %cst_123 : f32 to vector<16x1xf32>
    %302 = arith.addf %298, %301 : vector<16x1xf32>
    %303 = math.rsqrt %302 : vector<16x1xf32>
    %304 = vector.broadcast %303 : vector<16x1xf32> to vector<16x32xf32>
    %305 = arith.mulf %300, %304 : vector<16x32xf32>
    %306 = vector.broadcast %285 : vector<1x32xf32> to vector<16x32xf32>
    %307 = arith.mulf %305, %306 : vector<16x32xf32>
    %308 = vector.broadcast %287 : vector<1x32xf32> to vector<16x32xf32>
    %309 = arith.addf %307, %308 : vector<16x32xf32>
    %c1_124 = arith.constant 1 : index
    %c0_125 = arith.constant 0 : index
    %c0_126 = arith.constant 0 : index
    %310 = vector.load %arg9[%c1_124, %c0_125, %c0_126] : memref<2x32x64xf32, #tpu.memory_space<vmem>>, vector<1x32x64xf32>
    %311 = vector.shape_cast %310 : vector<1x32x64xf32> to vector<32x64xf32>
    %cst_127 = arith.constant dense<0.000000e+00> : vector<16x64xf32>
    %312 = tpu.matmul %309, %311, %cst_127 {dimension_numbers = #tpu.dot_dimension_numbers<[1], [0], [0], [1], [0, 0, 1, 1], [], []>} : vector<16x32xf32>, vector<32x64xf32>, vector<16x64xf32> -> vector<16x64xf32>
    %c1_128 = arith.constant 1 : index
    %c0_129 = arith.constant 0 : index
    %c0_130 = arith.constant 0 : index
    %313 = vector.load %arg10[%c1_128, %c0_129, %c0_130] : memref<2x1x64xf32, #tpu.memory_space<vmem>>, vector<1x1x64xf32>
    %314 = vector.shape_cast %313 : vector<1x1x64xf32> to vector<1x64xf32>
    %315 = vector.broadcast %314 : vector<1x64xf32> to vector<16x64xf32>
    %316 = arith.addf %312, %315 : vector<16x64xf32>
    %cst_131 = arith.constant 0.000000e+00 : f32
    %317 = vector.broadcast %cst_131 : f32 to vector<16x64xf32>
    %318 = arith.maximumf %316, %317 : vector<16x64xf32>
    %c1_132 = arith.constant 1 : index
    %c0_133 = arith.constant 0 : index
    %c0_134 = arith.constant 0 : index
    %319 = vector.load %arg11[%c1_132, %c0_133, %c0_134] : memref<2x64x32xf32, #tpu.memory_space<vmem>>, vector<1x64x32xf32>
    %320 = vector.shape_cast %319 : vector<1x64x32xf32> to vector<64x32xf32>
    %cst_135 = arith.constant dense<0.000000e+00> : vector<16x32xf32>
    %321 = tpu.matmul %318, %320, %cst_135 {dimension_numbers = #tpu.dot_dimension_numbers<[1], [0], [0], [1], [0, 0, 1, 1], [], []>} : vector<16x64xf32>, vector<64x32xf32>, vector<16x32xf32> -> vector<16x32xf32>
    %c1_136 = arith.constant 1 : index
    %c0_137 = arith.constant 0 : index
    %c0_138 = arith.constant 0 : index
    %322 = vector.load %arg12[%c1_136, %c0_137, %c0_138] : memref<2x1x32xf32, #tpu.memory_space<vmem>>, vector<1x1x32xf32>
    %323 = vector.shape_cast %322 : vector<1x1x32xf32> to vector<1x32xf32>
    %324 = vector.broadcast %323 : vector<1x32xf32> to vector<16x32xf32>
    %325 = arith.addf %321, %324 : vector<16x32xf32>
    %326 = arith.addf %309, %325 : vector<16x32xf32>
    %c1_139 = arith.constant 1 : index
    %c0_140 = arith.constant 0 : index
    %c0_141 = arith.constant 0 : index
    %327 = vector.load %arg13[%c1_139, %c0_140, %c0_141] : memref<2x1x32xf32, #tpu.memory_space<vmem>>, vector<1x1x32xf32>
    %328 = vector.shape_cast %327 : vector<1x1x32xf32> to vector<1x32xf32>
    %c1_142 = arith.constant 1 : index
    %c0_143 = arith.constant 0 : index
    %c0_144 = arith.constant 0 : index
    %329 = vector.load %arg14[%c1_142, %c0_143, %c0_144] : memref<2x1x32xf32, #tpu.memory_space<vmem>>, vector<1x1x32xf32>
    %330 = vector.shape_cast %329 : vector<1x1x32xf32> to vector<1x32xf32>
    %cst_145 = arith.constant dense<0.000000e+00> : vector<16xf32>
    %331 = vector.multi_reduction <add>, %326, %cst_145 [1] : vector<16x32xf32> to vector<16xf32>
    %332 = vector.shape_cast %331 : vector<16xf32> to vector<16x1xf32>
    %cst_146 = arith.constant 3.200000e+01 : f32
    %333 = vector.broadcast %cst_146 : f32 to vector<16x1xf32>
    %334 = arith.divf %332, %333 : vector<16x1xf32>
    %335 = vector.broadcast %334 : vector<16x1xf32> to vector<16x32xf32>
    %336 = arith.subf %326, %335 : vector<16x32xf32>
    %337 = arith.mulf %336, %336 : vector<16x32xf32>
    %cst_147 = arith.constant dense<0.000000e+00> : vector<16xf32>
    %338 = vector.multi_reduction <add>, %337, %cst_147 [1] : vector<16x32xf32> to vector<16xf32>
    %339 = vector.shape_cast %338 : vector<16xf32> to vector<16x1xf32>
    %cst_148 = arith.constant 3.200000e+01 : f32
    %340 = vector.broadcast %cst_148 : f32 to vector<16x1xf32>
    %341 = arith.divf %339, %340 : vector<16x1xf32>
    %342 = vector.broadcast %334 : vector<16x1xf32> to vector<16x32xf32>
    %343 = arith.subf %326, %342 : vector<16x32xf32>
    %cst_149 = arith.constant 9.99999974E-6 : f32
    %344 = vector.broadcast %cst_149 : f32 to vector<16x1xf32>
    %345 = arith.addf %341, %344 : vector<16x1xf32>
    %346 = math.rsqrt %345 : vector<16x1xf32>
    %347 = vector.broadcast %346 : vector<16x1xf32> to vector<16x32xf32>
    %348 = arith.mulf %343, %347 : vector<16x32xf32>
    %349 = vector.broadcast %328 : vector<1x32xf32> to vector<16x32xf32>
    %350 = arith.mulf %348, %349 : vector<16x32xf32>
    %351 = vector.broadcast %330 : vector<1x32xf32> to vector<16x32xf32>
    %352 = arith.addf %350, %351 : vector<16x32xf32>
    %353 = vector.shape_cast %352 : vector<16x32xf32> to vector<2x8x32xf32>
    %cst_150 = arith.constant dense<0.000000e+00> : vector<2x32xf32>
    %354 = vector.multi_reduction <add>, %353, %cst_150 [1] : vector<2x8x32xf32> to vector<2x32xf32>
    %cst_151 = arith.constant 8.000000e+00 : f32
    %355 = vector.broadcast %cst_151 : f32 to vector<2x32xf32>
    %356 = arith.divf %354, %355 : vector<2x32xf32>
    %c0_152 = arith.constant 0 : index
    %c0_153 = arith.constant 0 : index
    %357 = vector.load %arg15[%c0_152, %c0_153] : memref<32x32xf32, #tpu.memory_space<vmem>>, vector<32x32xf32>
    %cst_154 = arith.constant dense<0.000000e+00> : vector<2x32xf32>
    %358 = tpu.matmul %356, %357, %cst_154 {dimension_numbers = #tpu.dot_dimension_numbers<[1], [0], [0], [1], [0, 0, 1, 1], [], []>} : vector<2x32xf32>, vector<32x32xf32>, vector<2x32xf32> -> vector<2x32xf32>
    %c0_155 = arith.constant 0 : index
    %c0_156 = arith.constant 0 : index
    %359 = vector.load %arg16[%c0_155, %c0_156] : memref<1x32xf32, #tpu.memory_space<vmem>>, vector<1x32xf32>
    %360 = vector.broadcast %359 : vector<1x32xf32> to vector<2x32xf32>
    %361 = arith.addf %358, %360 : vector<2x32xf32>
    %cst_157 = arith.constant 0.000000e+00 : f32
    %362 = vector.broadcast %cst_157 : f32 to vector<2x32xf32>
    %363 = arith.maximumf %361, %362 : vector<2x32xf32>
    %c0_158 = arith.constant 0 : index
    %c0_159 = arith.constant 0 : index
    %364 = vector.load %arg17[%c0_158, %c0_159] : memref<32x8xf32, #tpu.memory_space<vmem>>, vector<32x8xf32>
    %cst_160 = arith.constant dense<0.000000e+00> : vector<2x8xf32>
    %365 = tpu.matmul %363, %364, %cst_160 {dimension_numbers = #tpu.dot_dimension_numbers<[1], [0], [0], [1], [0, 0, 1, 1], [], []>} : vector<2x32xf32>, vector<32x8xf32>, vector<2x8xf32> -> vector<2x8xf32>
    %c0_161 = arith.constant 0 : index
    %c0_162 = arith.constant 0 : index
    %366 = vector.load %arg18[%c0_161, %c0_162] : memref<1x8xf32, #tpu.memory_space<vmem>>, vector<1x8xf32>
    %367 = vector.broadcast %366 : vector<1x8xf32> to vector<2x8xf32>
    %368 = arith.addf %365, %367 : vector<2x8xf32>
    %cst_163 = arith.constant 0.000000e+00 : f32
    %369 = vector.broadcast %cst_163 : f32 to vector<2x8xf32>
    %370 = arith.maximumf %368, %369 : vector<2x8xf32>
    %c0_164 = arith.constant 0 : index
    %c0_165 = arith.constant 0 : index
    %371 = vector.load %arg19[%c0_164, %c0_165] : memref<8x8xf32, #tpu.memory_space<vmem>>, vector<8x8xf32>
    %cst_166 = arith.constant dense<0.000000e+00> : vector<2x8xf32>
    %372 = tpu.matmul %370, %371, %cst_166 {dimension_numbers = #tpu.dot_dimension_numbers<[1], [0], [0], [1], [0, 0, 1, 1], [], []>} : vector<2x8xf32>, vector<8x8xf32>, vector<2x8xf32> -> vector<2x8xf32>
    %c0_167 = arith.constant 0 : index
    %c0_168 = arith.constant 0 : index
    %373 = vector.load %arg20[%c0_167, %c0_168] : memref<1x8xf32, #tpu.memory_space<vmem>>, vector<1x8xf32>
    %374 = vector.broadcast %373 : vector<1x8xf32> to vector<2x8xf32>
    %375 = arith.addf %372, %374 : vector<2x8xf32>
    %cst_169 = arith.constant 0.000000e+00 : f32
    %376 = vector.broadcast %cst_169 : f32 to vector<2x8xf32>
    %377 = arith.maximumf %375, %376 : vector<2x8xf32>
    %c0_170 = arith.constant 0 : index
    %c0_171 = arith.constant 0 : index
    %378 = vector.load %arg21[%c0_170, %c0_171] : memref<8x4xf32, #tpu.memory_space<vmem>>, vector<8x4xf32>
    %cst_172 = arith.constant dense<0.000000e+00> : vector<2x4xf32>
    %379 = tpu.matmul %377, %378, %cst_172 {dimension_numbers = #tpu.dot_dimension_numbers<[1], [0], [0], [1], [0, 0, 1, 1], [], []>} : vector<2x8xf32>, vector<8x4xf32>, vector<2x4xf32> -> vector<2x4xf32>
    %c0_173 = arith.constant 0 : index
    %c0_174 = arith.constant 0 : index
    %380 = vector.load %arg22[%c0_173, %c0_174] : memref<1x4xf32, #tpu.memory_space<vmem>>, vector<1x4xf32>
    %381 = vector.broadcast %380 : vector<1x4xf32> to vector<2x4xf32>
    %382 = arith.addf %379, %381 : vector<2x4xf32>
    %cst_175 = arith.constant 0.000000e+00 : f32
    %383 = vector.broadcast %cst_175 : f32 to vector<2x4xf32>
    %384 = arith.maximumf %382, %383 : vector<2x4xf32>
    %c0_176 = arith.constant 0 : index
    %c0_177 = arith.constant 0 : index
    %385 = vector.load %arg23[%c0_176, %c0_177] : memref<4x1xf32, #tpu.memory_space<vmem>>, vector<4x1xf32>
    %cst_178 = arith.constant dense<0.000000e+00> : vector<2x1xf32>
    %386 = tpu.matmul %384, %385, %cst_178 {dimension_numbers = #tpu.dot_dimension_numbers<[1], [0], [0], [1], [0, 0, 1, 1], [], []>} : vector<2x4xf32>, vector<4x1xf32>, vector<2x1xf32> -> vector<2x1xf32>
    %c0_179 = arith.constant 0 : index
    %c0_180 = arith.constant 0 : index
    %387 = vector.load %arg24[%c0_179, %c0_180] : memref<1x1xf32, #tpu.memory_space<vmem>>, vector<1x1xf32>
    %388 = vector.broadcast %387 : vector<1x1xf32> to vector<2x1xf32>
    %389 = arith.addf %386, %388 : vector<2x1xf32>
    %cst_181 = arith.constant 0.000000e+00 : f32
    %390 = vector.broadcast %cst_181 : f32 to vector<2x1xf32>
    %391 = arith.subf %390, %389 : vector<2x1xf32>
    %392 = math.exp %391 : vector<2x1xf32>
    %cst_182 = arith.constant 1.000000e+00 : f32
    %393 = vector.broadcast %cst_182 : f32 to vector<2x1xf32>
    %394 = arith.addf %393, %392 : vector<2x1xf32>
    %cst_183 = arith.constant 1.000000e+00 : f32
    %395 = vector.broadcast %cst_183 : f32 to vector<2x1xf32>
    %396 = arith.divf %395, %394 : vector<2x1xf32>
    %c0_184 = arith.constant 0 : index
    %c0_185 = arith.constant 0 : index
    %397 = vector.load %arg25[%c0_184, %c0_185] : memref<2x1xf32, #tpu.memory_space<vmem>>, vector<2x1xf32>
    tpu.vector_store %arg25[%c0_184, %c0_185], %396 {strides = array<i32>} : memref<2x1xf32, #tpu.memory_space<vmem>>, vector<2x1xf32>,
    return
  }
}

</mosaic_0001>

<bundles_post_ra>
// kernel: binary_classifier_forward.1
= control target key start
LH: loop header
LB: loop body
LE: loop exit
PB: predicated region body
PF: predicated region fallthrough
CT: control target
= control target key end

     0   :  { %vm126_vm0 = vcmask 261120   ;;  %v5445_v13 = vmov 0.0   ;;  %vm5446_vm1 = vmmov 0   ;;  %s6263_s26 = smov 96   ;;  %vm225_vm2 = vcmask 64512   ;;  %s6253_s29 = smov 112   ;;  %s6209_s3 = inlined_call_operand.vmem [shape: f32[2,32,96], index: 3, kind: input, shape index: {}]   ;;  %s6210_s0 = inlined_call_operand.vmem [shape: f32[2,8,32], index: 0, kind: input, shape index: {}]   ;;  %s6211_s2 = inlined_call_operand.vmem [shape: f32[8,32], index: 2, kind: input, shape index: {}]   ;;  %s6212_s4 = inlined_call_operand.vmem [shape: f32[2,1,96], index: 4, kind: input, shape index: {}]   ;;  %s6213_s1 = inlined_call_operand.vmem [shape: f32[2,8], index: 1, kind: input, shape index: {}]   ;;  %s6214_s5 = inlined_call_operand.vmem [shape: f32[2,32,32], index: 5, kind: input, shape index: {}]   ;;  %s6215_s6 = inlined_call_operand.vmem [shape: f32[2,1,32], index: 6, kind: input, shape index: {}]   ;;  %s6216_s9 = inlined_call_operand.vmem [shape: f32[2,32,64], index: 9, kind: input, shape index: {}]   ;;  %s6217_s11 = inlined_call_operand.vmem [shape: f32[2,64,32], index: 11, kind: input, shape index: {}]   ;;  %s6218_s7 = inlined_call_operand.vmem [shape: f32[2,1,32], index: 7, kind: input, shape index: {}]   ;;  %s6219_s8 = inlined_call_operand.vmem [shape: f32[2,1,32], index: 8, kind: input, shape index: {}]   ;;  %s6220_s10 = inlined_call_operand.vmem [shape: f32[2,1,64], index: 10, kind: input, shape index: {}]   ;;  %s6221_s12 = inlined_call_operand.vmem [shape: f32[2,1,32], index: 12, kind: input, shape index: {}]   ;;  %s6222_s13 = inlined_call_operand.vmem [shape: f32[2,1,32], index: 13, kind: input, shape index: {}]   ;;  %s6223_s14 = inlined_call_operand.vmem [shape: f32[2,1,32], index: 14, kind: input, shape index: {}]   ;;  %s6224_s15 = inlined_call_operand.vmem [shape: f32[32,32], index: 15, kind: input, shape index: {}]   ;;  %s6225_s17 = inlined_call_operand.vmem [shape: f32[32,8], index: 17, kind: input, shape index: {}]   ;;  %s6226_s16 = inlined_call_operand.vmem [shape: f32[1,32], index: 16, kind: input, shape index: {}]   ;;  %s6227_s19 = inlined_call_operand.vmem [shape: f32[8,8], index: 19, kind: input, shape index: {}]   ;;  %s6228_s18 = inlined_call_operand.vmem [shape: f32[1,8], index: 18, kind: input, shape index: {}]   ;;  %s6229_s21 = inlined_call_operand.vmem [shape: f32[8,4], index: 21, kind: input, shape index: {}]   ;;  %s6230_s20 = inlined_call_operand.vmem [shape: f32[1,8], index: 20, kind: input, shape index: {}]   ;;  %s6231_s23 = inlined_call_operand.vmem [shape: f32[4,1], index: 23, kind: input, shape index: {}]   ;;  %s6232_s24 = inlined_call_operand.<no memory space> [shape: f32[1,1], index: 24, kind: input, shape index: {}]   ;;  %s6233_s22 = inlined_call_operand.vmem [shape: f32[1,4], index: 22, kind: input, shape index: {}]   ;;  %s6234_s25 = inlined_call_operand.vmem [shape: f32[2,1], index: 25, kind: output, shape index: {}]  }
   0x1   :  { %6265 = sst [smem:[#allocation3_spill]] %s6209_s3  ;;  %4949 = vmatprep.subr.mxu1 %v5445_v13  ;;  %4951 = vmatprep.mubr.msk.f32.mxu1 %vm5446_vm1, %v5445_v13  ;;  %v5450_v22 = vmov 1966171168   ;;  %v96_v24 = vlaneseq  ;;  %v5451_v29 = vmov -1e+30   ;;  %s6245_s30 = smov 72  }
   0x2   :  { %6266 = sst [smem:[#allocation4_spill]] %s6210_s0  ;;  %s6257_s0 = smov 64   ;;  %v94_v23 = vunpack.c.l.s4 %v5450_v22  ;;  %vm2034_vm4 = vcmask 523264   ;;  %vm4237_vm5 = vcmask 1041409   ;;  %vm4573_vm6 = vcmask 1043456  }
   0x3   :  { %6267 = sst [smem:[#allocation5_spill]] %s6211_s2  ;;  %s6277_s28 = sld [smem:[#allocation4_spill]]  ;;  %v97_v27 = vshrl.u32 %v96_v24, 7  ;;  %vm4569_vm7 = vcmask 31744   ;;  %vm4653_vm8 = vcmask 1024  }
   0x4   :  { %6268 = sst [smem:[#allocation6_spill]] %s6212_s4  ;;  %s6278_s3 = sld [smem:[#allocation5_spill]]  ;;  %v95_v26 = vunpack.c.0.s8 %v94_v23 }
   0x5   :  { %6269 = sst [smem:[#allocation7_spill]] %s6213_s1  ;;  %s6279_s4 = sld [smem:[#allocation6_spill]]  ;;  %v214_v33 = vsub.s32 0, %v97_v27 }
   0x6   :  { %6270 = sst [smem:[#allocation8_spill]] %s6214_s5  ;;  %v98_v28 = vsub.s32 %v95_v26, %v97_v27  ;;  %s6255_s5 = smov 80  }
   0x7   :  { %6271 = sst [smem:[#allocation9_spill]] %s6215_s6  ;;  %s6276_s6 = sld [smem:[#allocation3_spill]] }
   0x8   :  { %6272 = sst [smem:[#allocation10_spill]] %s6216_s9  ;;  %s6251_s2 = smov 56  }
   0x9   :  { %6273 = sst [smem:[#allocation11_spill]] %s6217_s11  ;;  %v82_v5 = vld [vmem:[%s6277_s28] sm:$0xff]  ;;  %v83_v6 = vld [vmem:[%s6277_s28 + $0x8] sm:$0xff]  ;;  %s6259_s11 = smov 120  }
   0xa   :  { %6274 = sst [smem:[#allocation12_spill]] %s6218_s7  ;;  %v84_v8 = vmul.f32 5.656854, %v82_v5  ;;  %v86_v9 = vld [vmem:[%s6278_s3] sm:$0xff]  ;;  %v85_v10 = vmul.f32 5.656854, %v83_v6 }
   0xb   :  { %6275 = sst [smem:[#allocation13_spill]] %s6234_s25  ;;  %v4659_v14 = vld [vmem:[%s6279_s4] ss:$0 sm:$0xff]  ;;  %s6280_s28 = sld [smem:[#allocation7_spill]] }
   0xc   :  { %v5612_v11 = vadd.f32 %v86_v9, %v84_v8  ;;  %v5616_v12 = vadd.f32 %v86_v9, %v85_v10  ;;  %s6261_s7 = smov 88   ;;  %s6249_s3 = smov 48  }
   0xd   :  { %v115_v0 = vld [vmem:[%s6276_s6] sm:$0xff]  ;;  %v116_v1 = vld [vmem:[%s6276_s6 + $0x8] sm:$0xff]  ;;  %v117_v2 = vld [vmem:[%s6276_s6 + $0x10] sm:$0xff]  ;;  %s6243_s9 = smov 104   ;;  %s6247_s27 = smov 40  }
   0xe   :  { %v5257_v3 = vpack.c.bf16 %v116_v1, %v115_v0  ;;  %v118_v4 = vld [vmem:[%s6276_s6 + $0x18] sm:$0xff]  ;;  %4946 = vmatprep.mubr.msk.f32.mxu0 %vm126_vm0, %v5612_v11  ;;  %s6282_s1 = sld [smem:[#allocation9_spill]]  ;;  %s6289_s25 = smov 64  }
   0xf   :  { %v5261_v7 = vpack.c.bf16 %v118_v4, %v117_v2 }
  0x10   :  { %5258 = vmatprep.subr.bf16.mxu0 %v5257_v3 }
  0x11   :  { %5260 = vmatpush3.bf16.msra.mxu0 %v5257_v3  ;;  %v89_v25 = vld [vmem:[%s6280_s28] sm:$0x3]  ;;  %s6281_s28 = sld [smem:[#allocation8_spill]] }
  0x12   :  { %5262 = vmatprep.subr.bf16.mxu0 %v5261_v7  ;;  %vm90_vm3 = vcmp.gt.f32.partialorder %v89_v25, 0.0 }
  0x13   :  { %v91_v30 = vsel %vm90_vm3, 0.0, %v5451_v29 }
  0x14   :  { %v99_v31 = vrot.slane %v91_v30, %v98_v28 }
  0x15   :  { %5264 = vmatpush3.bf16.msra.mxu0 %v5261_v7 }
  0x16   :  { %4959 = vmatprep.subr.mxu0 %v5445_v13  ;;  %v107_v32 = vrot.slane %v99_v31, %v98_v28  ;;  %v100_v34 = vcombine.high %v99_v31, %v99_v31 }
  0x18   :  { %4947 = vmatmul.mubr.msk.f32.vlgmr.msra.gmra.mrb[0].mxu0 %vm126_vm0, %v5616_v12  ;;  %v5657_v35 = vrot.slane %v107_v32, %v214_v33  ;;  %v114_v36 = vrot.slane %v100_v34, %v98_v28 }
  0x19   :  { %4961 = vmatprep.mubr.msk.f32.mxu0 %vm5446_vm1, %v5445_v13 }
  0x1a   :  { %v5660_v40 = vrot.slane %v114_v36, %v214_v33 }
  0xeb   :  { %v4948_v15 = vpop.f32.mrb[0].mxu0 }
  0xec   :  { %v199_v16 = vpop.f32.mrb[1].mxu0  ;;  %v5633_v18 = vadd.f32 %v4948_v15, %v4659_v14 }
  0xed   :  { %v5629_v17 = vadd.f32 %v4659_v14, %v199_v16 }
  0xef   :  { %223 = vrot.lane.b32.xlu0 %v5629_v17, %s6263_s26 }
  0xf3   :  { %301 = vrot.lane.b32.xlu0 %v5633_v18, %s6263_s26  ;;  %s6290_s26 = smov 80  }
  0xf7   :  { %475 = vrot.lane.b32.xlu0 %v5633_v18, %s6257_s0 }
  0xfb   :  { %629 = vrot.lane.b32.xlu0 %v5633_v18, %s6259_s11 }
 0x161   :  { %v224_v19 = vpop.permute.xlu0 %223 }
 0x162   :  { %4950 = vmatpush3.xpose.msk.msra.mxu1 %vm225_vm2, %v224_v19 }
 0x163   :  { %4954 = vmatprep.subr.mxu1 %v5445_v13 }
 0x165   :  { %4952 = vmatmul.mubr.msk.f32.vlgmr.msra.gmra.mrb[0].mxu1 %vm225_vm2, %v5629_v17  ;;  %v302_v20 = vpop.permute.xlu0 %301 }
 0x166   :  { %4955 = vmatpush3.xpose.msk.msra.mxu1 %vm225_vm2, %v302_v20  ;;  %4956 = vmatprep.mubr.msk.f32.mxu1 %vm5446_vm1, %v5445_v13 }
 0x167   :  { %4964 = vmatprep.subr.mxu1 %v5445_v13 }
 0x169   :  { %4957 = vmatmul.mubr.msk.f32.vlgmr.msra.gmra.mrb[2].mxu1 %vm225_vm2, %v5633_v18  ;;  %v476_v21 = vpop.permute.xlu0 %475 }
 0x16a   :  { %4965 = vmatpush3.msra.mxu1 %v476_v21  ;;  %4966 = vmatprep.mubr.msk.f32.mxu1 %vm5446_vm1, %v5445_v13 }
 0x16b   :  { %4974 = vmatprep.subr.mxu1 %v5445_v13 }
 0x16d   :  { %v630_v46 = vpop.permute.xlu0 %629 }
 0x238   :  { %v296_v37 = vpop.f32.mrb[0].mxu1 }
 0x239   :  { %v297_v38 = vadd.f32 %v296_v37, %v5657_v35  ;;  %v4953_v39 = vpop.f32.mrb[1].mxu1 }
 0x23b   :  { %v377_v41 = vsel %vm225_vm2, %v297_v38, -inf }
 0x23c   :  { %378 = vmax.xlane.f32.xlu0 %v377_v41  ;;  %v373_v42 = vpop.f32.mrb[2].mxu1 }
 0x23d   :  { %v374_v43 = vadd.f32 %v373_v42, %v5660_v40  ;;  %v4958_v44 = vpop.f32.mrb[3].mxu1 }
 0x23e   :  { %v209_v44 = vld [vmem:[%s6281_s28 + $0x8] sm:$0xff] }
 0x23f   :  { %v380_v45 = vsel %vm225_vm2, %v374_v43, -inf }
 0x240   :  { %381 = vmax.xlane.f32.xlu1 %v380_v45  ;;  %v208_v45 = vld [vmem:[%s6281_s28] sm:$0xff] }
 0x252   :  { %399 = vrot.lane.b32.xlu0 %v5629_v17, %s6257_s0  ;;  %s6294_s0 = smov 72  }
 0x256   :  { %551 = vrot.lane.b32.xlu0 %v5629_v17, %s6259_s11  ;;  %s6295_s11 = smov 104  }
 0x2c9   :  { %v379_v47 = vpop.xlane.xlu0 %378 }
 0x2ca   :  { %v383_v54 = vsub.f32 %v297_v38, %v379_v47 }
 0x2cc   :  { %v385_v55 = vmul.f32 1.442695, %v383_v54 }
 0x2cd   :  { %v382_v48 = vpop.xlane.xlu1 %381  ;;  %v400_v49 = vpop.permute.xlu0 %399 }
 0x2ce   :  { %v384_v50 = vsub.f32 %v374_v43, %v382_v48  ;;  %4960 = vmatpush3.msra.mxu0 %v400_v49 }
 0x2cf   :  { %4969 = vmatprep.subr.mxu0 %v5445_v13 }
 0x2d0   :  { %v387_v51 = vmul.f32 1.442695, %v384_v50 }
 0x2d1   :  { %v552_v2 = vpop.permute.xlu0 %551 }
 0x2d2   :  { %5361 = vpow2.f32 %v387_v51 }
 0x2d3   :  { %5363 = vpow2.f32 %v385_v55 }
 0x2dc   :  { %v5362_v52 = vpop.eup %5361 }
 0x2dd   :  { %v392_v53 = vsel %vm225_vm2, %v5362_v52, 0.0  ;;  %v5364_v56 = vpop.eup %5363 }
 0x2de   :  { %393 = vadd.xlane.f32.xlu1 %v392_v53  ;;  %v389_v57 = vsel %vm225_vm2, %v5364_v56, 0.0 }
 0x2ef   :  { %631 = vrot.lane.b32.xlu1 %v5633_v18, %s6261_s7 }
 0x313   :  { %390 = vadd.xlane.f32.xlu1 %v389_v57 }
 0x324   :  { %553 = vrot.lane.b32.xlu1 %v5629_v17, %s6261_s7  ;;  %s6284_s7 = sld [smem:[#allocation11_spill]] }
 0x328   :  { %1045 = vrot.lane.b32.xlu1 %v5629_v17, %s6255_s5 }
 0x36b   :  { %v394_v58 = vpop.xlane.xlu1 %393 }
 0x36c   :  { %5365 = vrcp.f32 %v394_v58 }
 0x36f   :  { %v632_v61 = vpop.permute.xlu1 %631 }
 0x376   :  { %v5366_v59 = vpop.eup %5365 }
 0x377   :  { %v398_v60 = vmul.f32 %v5366_v59, %v5362_v52 }
 0x379   :  { %4967 = vmatmul.mubr.msk.f32.vlgmr.msra.gmra.mrb[4].mxu1 %vm225_vm2, %v398_v60 }
 0x37a   :  { %4975 = vmatpush3.xpose.msk.msra.mxu1 %vm225_vm2, %v632_v61  ;;  %4976 = vmatprep.mubr.msk.f32.mxu1 %vm5446_vm1, %v5445_v13 }
 0x37b   :  { %4984 = vmatprep.subr.mxu1 %v5445_v13 }
 0x37d   :  { %4977 = vmatmul.mubr.msk.f32.vlgmr.msra.gmra.mrb[6].mxu1 %vm225_vm2, %v630_v46 }
 0x37e   :  { %4986 = vmatprep.mubr.msk.f32.mxu1 %vm5446_vm1, %v5445_v13 }
 0x3a0   :  { %v391_v62 = vpop.xlane.xlu1 %390 }
 0x3a1   :  { %5367 = vrcp.f32 %v391_v62 }
 0x3a4   :  { %v554_v1 = vpop.permute.xlu1 %553 }
 0x3a8   :  { %v1046_v34 = vpop.permute.xlu1 %1045 }
 0x3ab   :  { %v5368_v63 = vpop.eup %5367 }
 0x3ac   :  { %v397_v0 = vmul.f32 %v5368_v63, %v5364_v56 }
 0x3ae   :  { %4962 = vmatmul.mubr.msk.f32.vlgmr.msra.gmra.mrb[2].mxu0 %vm225_vm2, %v397_v0 }
 0x3af   :  { %4970 = vmatpush3.xpose.msk.msra.mxu0 %vm225_vm2, %v554_v1  ;;  %4971 = vmatprep.mubr.msk.f32.mxu0 %vm5446_vm1, %v5445_v13 }
 0x3b0   :  { %4979 = vmatprep.subr.mxu0 %v5445_v13 }
 0x3b2   :  { %4972 = vmatmul.mubr.msk.f32.vlgmr.msra.gmra.mrb[4].mxu0 %vm225_vm2, %v552_v2 }
 0x3b3   :  { %4981 = vmatprep.mubr.msk.f32.mxu0 %vm5446_vm1, %v5445_v13 }
 0x44c   :  { %v5694_v3 = vpop.f32.mrb[4].mxu1 }
 0x44d   :  { %v4968_v4 = vpop.f32.mrb[5].mxu1 }
 0x450   :  { %v703_v5 = vpop.f32.mrb[6].mxu1 }
 0x451   :  { %v704_v6 = vadd.f32 %v703_v5, %v5660_v40  ;;  %v4978_v7 = vpop.f32.mrb[7].mxu1 }
 0x453   :  { %v710_v8 = vsel %vm225_vm2, %v704_v6, -inf }
 0x454   :  { %711 = vmax.xlane.f32.xlu0 %v710_v8 }
 0x46a   :  { %805 = vrot.lane.b32.xlu0 %v5633_v18, %s6251_s2 }
 0x46e   :  { %1043 = vrot.lane.b32.xlu0 %v5629_v17, %s6253_s29 }
 0x472   :  { %1123 = vrot.lane.b32.xlu0 %v5633_v18, %s6255_s5  ;;  %s6292_s5 = smov 56  }
 0x481   :  { %v5704_v9 = vpop.f32.mrb[2].mxu0 }
 0x482   :  { %v4963_v10 = vpop.f32.mrb[3].mxu0 }
 0x485   :  { %v625_v14 = vpop.f32.mrb[4].mxu0 }
 0x486   :  { %v4973_v15 = vpop.f32.mrb[5].mxu0  ;;  %v626_v16 = vadd.f32 %v625_v14, %v5657_v35 }
 0x488   :  { %v707_v19 = vsel %vm225_vm2, %v626_v16, -inf }
 0x491   :  { %708 = vmax.xlane.f32.xlu0 %v707_v19 }
 0x4a7   :  { %729 = vrot.lane.b32.xlu0 %v5629_v17, %s6251_s2  ;;  %s6285_s2 = sld [smem:[#allocation12_spill]] }
 0x4ab   :  { %1221 = vrot.lane.b32.xlu0 %v5629_v17, %s6249_s3 }
 0x4af   :  { %1458 = vrot.lane.b32.xlu0 %v5629_v17, %s6245_s30 }
 0x4b3   :  { %1536 = vrot.lane.b32.xlu0 %v5633_v18, %s6245_s30  ;;  %s6288_s30 = smov 120  }
 0x4b7   :  { %1456 = vrot.lane.b32.xlu0 %v5629_v17, %s6243_s9 }
 0x4bb   :  { %1534 = vrot.lane.b32.xlu0 %v5633_v18, %s6243_s9  ;;  %s6283_s9 = sld [smem:[#allocation10_spill]] }
 0x4e1   :  { %v712_v20 = vpop.xlane.xlu0 %711 }
 0x4e2   :  { %v714_v21 = vsub.f32 %v704_v6, %v712_v20 }
 0x4e4   :  { %v717_v22 = vmul.f32 1.442695, %v714_v21 }
 0x4e5   :  { %v806_v23 = vpop.permute.xlu0 %805 }
 0x4e6   :  { %5369 = vpow2.f32 %v717_v22  ;;  %4985 = vmatpush3.msra.mxu1 %v806_v23 }
 0x4e7   :  { %4999 = vmatprep.subr.mxu1 %v5445_v13 }
 0x4e9   :  { %v1044_v26 = vpop.permute.xlu0 %1043 }
 0x4ed   :  { %v1124_v27 = vpop.permute.xlu0 %1123 }
 0x4f0   :  { %v5370_v24 = vpop.eup %5369 }
 0x4f1   :  { %v722_v25 = vsel %vm225_vm2, %v5370_v24, 0.0 }
 0x4f2   :  { %723 = vadd.xlane.f32.xlu1 %v722_v25 }
 0x503   :  { %1121 = vrot.lane.b32.xlu1 %v5633_v18, %s6253_s29 }
 0x51e   :  { %v709_v28 = vpop.xlane.xlu0 %708 }
 0x51f   :  { %v713_v29 = vsub.f32 %v626_v16, %v709_v28 }
 0x521   :  { %v715_v30 = vmul.f32 1.442695, %v713_v29 }
 0x522   :  { %v730_v31 = vpop.permute.xlu0 %729 }
 0x523   :  { %5371 = vpow2.f32 %v715_v30  ;;  %4980 = vmatpush3.msra.mxu0 %v730_v31 }
 0x524   :  { %4989 = vmatprep.subr.mxu0 %v209_v44 }
 0x526   :  { %v1222_v58 = vpop.permute.xlu0 %1221 }
 0x52d   :  { %v5372_v32 = vpop.eup %5371 }
 0x52e   :  { %v719_v33 = vsel %vm225_vm2, %v5372_v32, 0.0 }
 0x52f   :  { %720 = vadd.xlane.f32.xlu1 %v719_v33 }
 0x57f   :  { %v724_v36 = vpop.xlane.xlu1 %723 }
 0x580   :  { %5373 = vrcp.f32 %v724_v36 }
 0x583   :  { %v1122_v39 = vpop.permute.xlu1 %1121 }
 0x58a   :  { %v5374_v37 = vpop.eup %5373 }
 0x58b   :  { %v728_v38 = vmul.f32 %v5374_v37, %v5370_v24 }
 0x58d   :  { %4987 = vmatmul.mubr.msk.f32.vlgmr.msra.gmra.mrb[8].mxu1 %vm225_vm2, %v728_v38 }
 0x58e   :  { %5000 = vmatpush3.xpose.msk.msra.mxu1 %vm225_vm2, %v1046_v34  ;;  %5001 = vmatprep.mubr.msk.f32.mxu1 %vm5446_vm1, %v5445_v13 }
 0x58f   :  { %5004 = vmatprep.subr.mxu1 %v5445_v13 }
 0x591   :  { %5002 = vmatmul.mubr.msk.f32.vlgmr.msra.gmra.mrb[10].mxu1 %vm225_vm2, %v1044_v26 }
 0x592   :  { %5005 = vmatpush3.xpose.msk.msra.mxu1 %vm225_vm2, %v1124_v27  ;;  %5006 = vmatprep.mubr.msk.f32.mxu1 %vm5446_vm1, %v5445_v13 }
 0x593   :  { %5014 = vmatprep.subr.mxu1 %v5445_v13 }
 0x595   :  { %5007 = vmatmul.mubr.msk.f32.vlgmr.msra.gmra.mrb[12].mxu1 %vm225_vm2, %v1122_v39 }
 0x596   :  { %5016 = vmatprep.mubr.msk.f32.mxu1 %vm5446_vm1, %v5445_v13 }
 0x5bc   :  { %v721_v41 = vpop.xlane.xlu1 %720 }
 0x5bd   :  { %5375 = vrcp.f32 %v721_v41 }
 0x5c7   :  { %v5376_v42 = vpop.eup %5375 }
 0x5c8   :  { %v727_v43 = vmul.f32 %v5376_v42, %v5372_v32 }
 0x5ca   :  { %4982 = vmatmul.mubr.msk.f32.vlgmr.msra.gmra.mrb[6].mxu0 %vm225_vm2, %v727_v43 }
 0x5cb   :  { %4990 = vmatpush3.msra.mxu0 %v209_v44 }
 0x5cc   :  { %4994 = vmatprep.subr.mxu0 %v208_v45 }
 0x660   :  { %v877_v46 = vpop.f32.mrb[8].mxu1 }
 0x661   :  { %v4988_v47 = vpop.f32.mrb[9].mxu1 }
 0x664   :  { %v1117_v48 = vpop.f32.mrb[10].mxu1 }
 0x665   :  { %v1118_v49 = vadd.f32 %v1117_v48, %v5657_v35  ;;  %v5003_v50 = vpop.f32.mrb[11].mxu1 }
 0x666   :  { %v211_v50 = vld [vmem:[%s6281_s28 + $0x18] sm:$0xff] }
 0x667   :  { %v1199_v51 = vsel %vm225_vm2, %v1118_v49, -inf }
 0x668   :  { %v1195_v52 = vpop.f32.mrb[12].mxu1  ;;  %1200 = vmax.xlane.f32.xlu1 %v1199_v51 }
 0x669   :  { %v1196_v53 = vadd.f32 %v1195_v52, %v5660_v40  ;;  %v5008_v54 = vpop.f32.mrb[13].mxu1 }
 0x66b   :  { %v1202_v55 = vsel %vm225_vm2, %v1196_v53, -inf }
 0x66c   :  { %1203 = vmax.xlane.f32.xlu1 %v1202_v55 }
 0x69d   :  { %v801_v56 = vpop.f32.mrb[6].mxu0 }
 0x69e   :  { %v4983_v57 = vpop.f32.mrb[7].mxu0  ;;  %4991 = vmatprep.mubr.msk.f32.mxu0 %vm225_vm2, %v801_v56 }
 0x69f   :  { %4992 = vmatmul.mubr.msk.f32.vlgmr.msra.gmra.mrb[8].mxu0 %vm225_vm2, %v877_v46  ;;  %v4694_v57 = vld [vmem:[%s6282_s1] ss:$0 sm:$0xff] }
 0x6a0   :  { %4996 = vmatprep.mubr.msk.f32.mxu0 %vm225_vm2, %v5704_v9  ;;  %4995 = vmatpush3.msra.mxu0 %v208_v45  ;;  %v1459_v9 = vpop.permute.xlu0 %1458 }
 0x6a1   :  { %5009 = vmatprep.subr.mxu0 %v5445_v13 }
 0x6a4   :  { %v1537_v16 = vpop.permute.xlu0 %1536 }
 0x6a7   :  { %4997 = vmatmul.mubr.msk.f32.vlgmr.msra.gmra.mrb[8].mxu0 %vm225_vm2, %v5694_v3  ;;  %v210_v3 = vld [vmem:[%s6281_s28 + $0x10] sm:$0xff] }
 0x6a8   :  { %5010 = vmatpush3.msra.mxu0 %v1222_v58  ;;  %5011 = vmatprep.mubr.msk.f32.mxu0 %vm5446_vm1, %v5445_v13  ;;  %v1457_v20 = vpop.permute.xlu0 %1456 }
 0x6a9   :  { %5019 = vmatprep.subr.mxu0 %v210_v3 }
 0x6ac   :  { %v1535_v25 = vpop.permute.xlu0 %1534 }
 0x6f5   :  { %v1201_v59 = vpop.xlane.xlu1 %1200 }
 0x6f6   :  { %v1205_v60 = vsub.f32 %v1118_v49, %v1201_v59 }
 0x6f8   :  { %v1207_v61 = vmul.f32 1.442695, %v1205_v60 }
 0x6f9   :  { %v1204_v62 = vpop.xlane.xlu1 %1203 }
 0x6fa   :  { %5377 = vpow2.f32 %v1207_v61  ;;  %v1206_v63 = vsub.f32 %v1196_v53, %v1204_v62 }
 0x6fc   :  { %v1209_v0 = vmul.f32 1.442695, %v1206_v63 }
 0x6fe   :  { %5379 = vpow2.f32 %v1209_v0 }
 0x704   :  { %v5378_v1 = vpop.eup %5377 }
 0x705   :  { %v1211_v2 = vsel %vm225_vm2, %v5378_v1, 0.0 }
 0x706   :  { %1212 = vadd.xlane.f32.xlu1 %v1211_v2 }
 0x708   :  { %v5380_v4 = vpop.eup %5379 }
 0x709   :  { %v1214_v5 = vsel %vm225_vm2, %v5380_v4, 0.0 }
 0x70a   :  { %1215 = vadd.xlane.f32.xlu1 %v1214_v5 }
 0x71b   :  { %1297 = vrot.lane.b32.xlu1 %v5633_v18, %s6249_s3  ;;  %s6291_s3 = smov 112  }
 0x793   :  { %v1213_v6 = vpop.xlane.xlu1 %1212 }
 0x794   :  { %5381 = vrcp.f32 %v1213_v6 }
 0x797   :  { %v1216_v7 = vpop.xlane.xlu1 %1215 }
 0x798   :  { %5383 = vrcp.f32 %v1216_v7 }
 0x79b   :  { %v1298_v8 = vpop.permute.xlu1 %1297 }
 0x79c   :  { %5015 = vmatpush3.msra.mxu1 %v1298_v8 }
 0x79d   :  { %5024 = vmatprep.subr.mxu1 %v5445_v13 }
 0x79e   :  { %v5382_v10 = vpop.eup %5381 }
 0x79f   :  { %v1219_v14 = vmul.f32 %v5382_v10, %v5378_v1 }
 0x7a1   :  { %5012 = vmatmul.mubr.msk.f32.vlgmr.msra.gmra.mrb[10].mxu0 %vm225_vm2, %v1219_v14  ;;  %v1926_v14 = vld [vmem:[%s6283_s9 + $0x8] sm:$0xff] }
 0x7a2   :  { %v5384_v15 = vpop.eup %5383  ;;  %5020 = vmatpush3.msra.mxu0 %v210_v3 }
 0x7a3   :  { %v1220_v19 = vmul.f32 %v5384_v15, %v5380_v4  ;;  %5029 = vmatprep.subr.mxu0 %v5445_v13 }
 0x7a5   :  { %5017 = vmatmul.mubr.msk.f32.vlgmr.msra.gmra.mrb[14].mxu1 %vm225_vm2, %v1220_v19  ;;  %v1928_v19 = vld [vmem:[%s6283_s9 + $0x18] sm:$0xff] }
 0x7a6   :  { %5025 = vmatpush3.xpose.msk.msra.mxu1 %vm225_vm2, %v1459_v9  ;;  %5026 = vmatprep.mubr.msk.f32.mxu1 %vm5446_vm1, %v5445_v13 }
 0x7a7   :  { %5034 = vmatprep.subr.mxu1 %v5445_v13 }
 0x7a9   :  { %5027 = vmatmul.mubr.msk.f32.vlgmr.msra.gmra.mrb[16].mxu1 %vm225_vm2, %v1457_v20 }
 0x7aa   :  { %5036 = vmatprep.mubr.msk.f32.mxu1 %vm5446_vm1, %v5445_v13 }
 0x874   :  { %v1293_v21 = vpop.f32.mrb[10].mxu0 }
 0x875   :  { %v5013_v22 = vpop.f32.mrb[11].mxu0  ;;  %5021 = vmatprep.mubr.msk.f32.mxu0 %vm225_vm2, %v1293_v21  ;;  %v2019_v21 = vld [vmem:[%s6284_s7] sm:$0xff] }
 0x876   :  { %v2020_v22 = vld [vmem:[%s6284_s7 + $0x8] sm:$0xff] }
 0x878   :  { %v1369_v23 = vpop.f32.mrb[14].mxu1 }
 0x879   :  { %v5018_v24 = vpop.f32.mrb[15].mxu1  ;;  %5022 = vmatmul.mubr.msk.f32.vlgmr.msra.gmra.mrb[8].mxu0 %vm225_vm2, %v1369_v23  ;;  %v2021_v23 = vld [vmem:[%s6284_s7 + $0x10] sm:$0xff] }
 0x87a   :  { %5030 = vmatpush3.xpose.msk.msra.mxu0 %vm225_vm2, %v1537_v16  ;;  %5031 = vmatprep.mubr.msk.f32.mxu0 %vm5446_vm1, %v5445_v13  ;;  %v1927_v16 = vld [vmem:[%s6283_s9 + $0x10] sm:$0xff]  ;;  %v5273_v24 = vpack.c.bf16 %v2020_v22, %v2019_v21 }
 0x87b   :  { %5039 = vmatprep.subr.mxu0 %v5445_v13  ;;  %v5269_v20 = vpack.c.bf16 %v1928_v19, %v1927_v16  ;;  %v4708_v16 = vld [vmem:[%s6276_s6 + $0x38] sm:$0xff] }
 0x87c   :  { %v1530_v26 = vpop.f32.mrb[16].mxu1 }
 0x87d   :  { %v1531_v27 = vadd.f32 %v1530_v26, %v5657_v35  ;;  %v5028_v28 = vpop.f32.mrb[17].mxu1  ;;  %5032 = vmatmul.mubr.msk.f32.vlgmr.msra.gmra.mrb[12].mxu0 %vm225_vm2, %v1535_v25  ;;  %v2022_v25 = vld [vmem:[%s6284_s7 + $0x18] sm:$0xff] }
 0x87e   :  { %5041 = vmatprep.mubr.msk.f32.mxu0 %vm5446_vm1, %v5445_v13  ;;  %v5277_v26 = vpack.c.bf16 %v2022_v25, %v2021_v23  ;;  %v2024_v28 = vld [vmem:[%s6284_s7 + $0x28] sm:$0xff] }
 0x87f   :  { %v1612_v29 = vsel %vm225_vm2, %v1531_v27, -inf }
 0x880   :  { %1613 = vmax.xlane.f32.xlu1 %v1612_v29 }
 0x90d   :  { %v1614_v30 = vpop.xlane.xlu1 %1613 }
 0x90e   :  { %v1618_v31 = vsub.f32 %v1531_v27, %v1614_v30  ;;  %v2023_v27 = vld [vmem:[%s6284_s7 + $0x20] sm:$0xff] }
 0x90f   :  { %v5281_v29 = vpack.c.bf16 %v2024_v28, %v2023_v27  ;;  %v4703_v27 = vld [vmem:[%s6222_s13] ss:$0 sm:$0xff] }
 0x910   :  { %v1620_v32 = vmul.f32 1.442695, %v1618_v31 }
 0x912   :  { %5385 = vpow2.f32 %v1620_v32 }
 0x91c   :  { %v5386_v38 = vpop.eup %5385 }
 0x91d   :  { %v1624_v39 = vsel %vm225_vm2, %v5386_v38, 0.0 }
 0x950   :  { %v1608_v33 = vpop.f32.mrb[12].mxu0 }
 0x951   :  { %v1609_v34 = vadd.f32 %v1608_v33, %v5660_v40  ;;  %v5033_v36 = vpop.f32.mrb[13].mxu0 }
 0x953   :  { %v1615_v37 = vsel %vm225_vm2, %v1609_v34, -inf }
 0x954   :  { %1616 = vmax.xlane.f32.xlu0 %v1615_v37 }
 0x958   :  { %1625 = vadd.xlane.f32.xlu0 %v1624_v39 }
 0x96e   :  { %1634 = vrot.lane.b32.xlu0 %v5629_v17, %s6247_s27 }
 0x9e1   :  { %v1617_v41 = vpop.xlane.xlu0 %1616 }
 0x9e2   :  { %v1619_v42 = vsub.f32 %v1609_v34, %v1617_v41 }
 0x9e4   :  { %v1622_v43 = vmul.f32 1.442695, %v1619_v42 }
 0x9e5   :  { %v1626_v44 = vpop.xlane.xlu0 %1625 }
 0x9e6   :  { %5387 = vpow2.f32 %v1622_v43  ;;  %v4696_v43 = vld [vmem:[%s6219_s8] ss:$0 sm:$0xff] }
 0x9e7   :  { %5389 = vrcp.f32 %v1626_v44 }
 0x9e9   :  { %v1635_v45 = vpop.permute.xlu0 %1634 }
 0x9ea   :  { %5035 = vmatpush3.msra.mxu1 %v1635_v45 }
 0x9f0   :  { %v5388_v46 = vpop.eup %5387 }
 0x9f1   :  { %v5390_v47 = vpop.eup %5389  ;;  %v1627_v48 = vsel %vm225_vm2, %v5388_v46, 0.0 }
 0x9f2   :  { %v1632_v49 = vmul.f32 %v5390_v47, %v5386_v38  ;;  %1628 = vadd.xlane.f32.xlu1 %v1627_v48  ;;  %v4695_v38 = vld [vmem:[%s6285_s2] ss:$0 sm:$0xff]  ;;  %v2025_v48 = vld [vmem:[%s6284_s7 + $0x30] sm:$0xff] }
 0x9f4   :  { %5037 = vmatmul.mubr.msk.f32.vlgmr.msra.gmra.mrb[18].mxu1 %vm225_vm2, %v1632_v49  ;;  %v2026_v49 = vld [vmem:[%s6284_s7 + $0x38] sm:$0xff] }
 0xa03   :  { %1710 = vrot.lane.b32.xlu1 %v5633_v18, %s6247_s27  ;;  %s6286_s27 = smov 96  }
 0xa7f   :  { %v1629_v17 = vpop.xlane.xlu1 %1628 }
 0xa80   :  { %5391 = vrcp.f32 %v1629_v17  ;;  %v5285_v17 = vpack.c.bf16 %v2026_v49, %v2025_v48 }
 0xa83   :  { %v1711_v51 = vpop.permute.xlu1 %1710 }
 0xa84   :  { %5040 = vmatpush3.msra.mxu0 %v1711_v51 }
 0xa85   :  { %5044 = vmatprep.subr.mxu0 %v211_v50 }
 0xa8a   :  { %v5392_v52 = vpop.eup %5391 }
 0xa8b   :  { %v1633_v53 = vmul.f32 %v5392_v52, %v5388_v46 }
 0xa8d   :  { %5042 = vmatmul.mubr.msk.f32.vlgmr.msra.gmra.mrb[14].mxu0 %vm225_vm2, %v1633_v53 }
 0xa8e   :  { %5045 = vmatpush3.msra.mxu0 %v211_v50  ;;  %v4697_v50 = vld [vmem:[%s6220_s10] ss:$0 sm:$0xff] }
 0xa8f   :  { %5274 = vmatprep.subr.bf16.mxu0 %v5273_v24 }
 0xac7   :  { %v1706_v54 = vpop.f32.mrb[18].mxu1 }
 0xac8   :  { %v5038_v55 = vpop.f32.mrb[19].mxu1  ;;  %5046 = vmatprep.mubr.msk.f32.mxu0 %vm225_vm2, %v1706_v54 }
 0xb60   :  { %v1782_v56 = vpop.f32.mrb[14].mxu0 }
 0xb61   :  { %v5043_v18 = vpop.f32.mrb[15].mxu0  ;;  %5047 = vmatmul.mubr.msk.f32.vlgmr.msra.gmra.mrb[8].mxu0 %vm225_vm2, %v1782_v56 }
 0xb62   :  { %5276 = vmatpush3.bf16.msra.mxu0 %v5273_v24  ;;  %v4700_v18 = vld [vmem:[%s6221_s12] ss:$0 sm:$0xff] }
 0xb63   :  { %5278 = vmatprep.subr.bf16.mxu0 %v5277_v26 }
 0xb66   :  { %5280 = vmatpush3.bf16.msra.mxu0 %v5277_v26 }
 0xb67   :  { %5282 = vmatprep.subr.bf16.mxu0 %v5281_v29 }
 0xb6a   :  { %5284 = vmatpush3.bf16.msra.mxu0 %v5281_v29 }
 0xb6b   :  { %5286 = vmatprep.subr.bf16.mxu0 %v5285_v17 }
 0xb6e   :  { %5288 = vmatpush3.bf16.msra.mxu0 %v5285_v17 }
 0xb6f   :  { %5100 = vmatprep.subr.mxu0 %v5445_v13 }
 0xc34   :  { %v5048_v58 = vpop.f32.mrb[8].mxu0 }
 0xc35   :  { %v1877_v59 = vadd.f32 %v5048_v58, %v4694_v57  ;;  %v1858_v60 = vpop.f32.mrb[9].mxu0 }
 0xc36   :  { %v1876_v61 = vadd.f32 %v4694_v57, %v1858_v60 }
 0xc37   :  { %v1879_v62 = vadd.f32 %v1877_v59, %v5616_v12 }
 0xc38   :  { %v1878_v63 = vadd.f32 %v1876_v61, %v5612_v11  ;;  %v1925_v11 = vld [vmem:[%s6283_s9] sm:$0xff] }
 0xc39   :  { %v1885_v0 = vsel %vm126_vm0, %v1879_v62, 0.0  ;;  %v5265_v15 = vpack.c.bf16 %v1926_v14, %v1925_v11  ;;  %v4706_v11 = vld [vmem:[%s6276_s6 + $0x28] sm:$0xff] }
 0xc3a   :  { %1886 = vadd.xlane.f32.xlu0 %v1885_v0  ;;  %v1882_v1 = vsel %vm126_vm0, %v1878_v63, 0.0 }
 0xc3b   :  { %1883 = vadd.xlane.f32.xlu1 %v1882_v1  ;;  %5266 = vmatprep.subr.bf16.mxu1 %v5265_v15 }
 0xc3c   :  { %5268 = vmatpush3.bf16.msra.mxu1 %v5265_v15  ;;  %v4707_v15 = vld [vmem:[%s6276_s6 + $0x30] sm:$0xff] }
 0xc3d   :  { %5270 = vmatprep.subr.bf16.mxu1 %v5269_v20  ;;  %v5293_v19 = vpack.c.bf16 %v4708_v16, %v4707_v15 }
 0xc40   :  { %5272 = vmatpush3.bf16.msra.mxu1 %v5269_v20 }
 0xcc7   :  { %v1887_v2 = vpop.xlane.xlu0 %1886 }
 0xcc8   :  { %v1890_v4 = vmul.f32 0.03125, %v1887_v2  ;;  %v1884_v5 = vpop.xlane.xlu1 %1883 }
 0xcc9   :  { %v1889_v3 = vmul.f32 0.03125, %v1884_v5 }
 0xcca   :  { %v1892_v6 = vsub.f32 %v1879_v62, %v1890_v4 }
 0xccb   :  { %v1891_v7 = vsub.f32 %v1878_v63, %v1889_v3 }
 0xccc   :  { %v1894_v8 = vmul.f32 %v1892_v6, %v1892_v6 }
 0xccd   :  { %v1893_v9 = vmul.f32 %v1891_v7, %v1891_v7 }
 0xcce   :  { %v1898_v10 = vsel %vm126_vm0, %v1894_v8, 0.0 }
 0xccf   :  { %1899 = vadd.xlane.f32.xlu1 %v1898_v10  ;;  %v1895_v12 = vsel %vm126_vm0, %v1893_v9, 0.0 }
 0xcd0   :  { %1896 = vadd.xlane.f32.xlu0 %v1895_v12  ;;  %v4705_v12 = vld [vmem:[%s6276_s6 + $0x20] sm:$0xff]  ;;  %s6293_s6 = smov 48  }
 0xcd1   :  { %v5289_v14 = vpack.c.bf16 %v4706_v11, %v4705_v12 }
 0xcd3   :  { %5290 = vmatprep.subr.bf16.mxu1 %v5289_v14 }
 0xd5c   :  { %v1900_v30 = vpop.xlane.xlu1 %1899 }
 0xd5d   :  { %v1902_v31 = vmul.f32 0.03125, %v1900_v30  ;;  %v1897_v32 = vpop.xlane.xlu0 %1896 }
 0xd5e   :  { %v1901_v33 = vmul.f32 0.03125, %v1897_v32 }
 0xd5f   :  { %v1904_v34 = vadd.f32 1e-05, %v1902_v31  ;;  %v4704_v31 = vld [vmem:[%s6223_s14] ss:$0 sm:$0xff] }
 0xd60   :  { %v1903_v36 = vadd.f32 1e-05, %v1901_v33 }
 0xd61   :  { %5393 = vrsqrt.f32 %v1904_v34 }
 0xd62   :  { %5395 = vrsqrt.f32 %v1903_v36 }
 0xd6b   :  { %v5394_v37 = vpop.eup %5393 }
 0xd6c   :  { %v5396_v39 = vpop.eup %5395  ;;  %v1908_v41 = vmul.f32 %v5394_v37, %v1892_v6  ;;  %v4710_v37 = vld [vmem:[%s6279_s4 + $0x1] ss:$0 sm:$0xff]  ;;  %s6287_s4 = smov 88  }
 0xd6d   :  { %v1907_v42 = vmul.f32 %v5396_v39, %v1891_v7 }
 0xd6e   :  { %v1916_v44 = vmul.f32 %v4695_v38, %v1908_v41 }
 0xd6f   :  { %v1915_v45 = vmul.f32 %v4695_v38, %v1907_v42 }
 0xd70   :  { %v1924_v47 = vadd.f32 %v4696_v43, %v1916_v44 }
 0xd71   :  { %v1923_v46 = vadd.f32 %v4696_v43, %v1915_v45 }
 0xd73   :  { %5057 = vmatprep.mubr.msk.f32.mxu1 %vm126_vm0, %v1923_v46 }
 0xd74   :  { %5058 = vmatmul.mubr.msk.f32.vlgmr.msra.gmra.mrb[20].mxu1 %vm126_vm0, %v1924_v47 }
 0xd75   :  { %5292 = vmatpush3.bf16.msra.mxu1 %v5289_v14 }
 0xd76   :  { %5294 = vmatprep.subr.bf16.mxu1 %v5293_v19 }
 0xd79   :  { %5296 = vmatpush3.bf16.msra.mxu1 %v5293_v19 }
 0xd7a   :  { %5090 = vmatprep.subr.mxu1 %v5445_v13 }
 0xe47   :  { %v5059_v51 = vpop.f32.mrb[20].mxu1 }
 0xe48   :  { %v2014_v52 = vadd.f32 %v5059_v51, %v4697_v50  ;;  %v2008_v53 = vpop.f32.mrb[21].mxu1 }
 0xe49   :  { %v2009_v54 = vadd.f32 %v4697_v50, %v2008_v53 }
 0xe4a   :  { %v2018_v56 = vmax.f32 %v2014_v52, 0.0 }
 0xe4b   :  { %v2017_v55 = vmax.f32 %v2009_v54, 0.0 }
 0xe4d   :  { %5076 = vmatprep.mubr.msk.f32.mxu0 %vm2034_vm4, %v2017_v55 }
 0xe4e   :  { %5077 = vmatmul.mubr.msk.f32.vlgmr.msra.gmra.mrb[16].mxu0 %vm2034_vm4, %v2018_v56 }
 0xe4f   :  { %5102 = vmatprep.mubr.msk.f32.mxu0 %vm5446_vm1, %v5445_v13 }
 0xf21   :  { %v5078_v57 = vpop.f32.mrb[16].mxu0 }
 0xf22   :  { %v2113_v58 = vadd.f32 %v5078_v57, %v4700_v18  ;;  %v2107_v59 = vpop.f32.mrb[17].mxu0 }
 0xf23   :  { %v2108_v60 = vadd.f32 %v4700_v18, %v2107_v59 }
 0xf24   :  { %v2117_v61 = vadd.f32 %v2113_v58, %v1924_v47 }
 0xf25   :  { %v2116_v62 = vadd.f32 %v2108_v60, %v1923_v46 }
 0xf26   :  { %v2123_v63 = vsel %vm126_vm0, %v2117_v61, 0.0 }
 0xf27   :  { %2124 = vadd.xlane.f32.xlu1 %v2123_v63  ;;  %v2120_v0 = vsel %vm126_vm0, %v2116_v62, 0.0 }
 0xf28   :  { %2121 = vadd.xlane.f32.xlu0 %v2120_v0 }
 0xfb4   :  { %v2125_v1 = vpop.xlane.xlu1 %2124 }
 0xfb5   :  { %v2127_v2 = vmul.f32 0.03125, %v2125_v1  ;;  %v2122_v4 = vpop.xlane.xlu0 %2121 }
 0xfb6   :  { %v2126_v5 = vmul.f32 0.03125, %v2122_v4 }
 0xfb7   :  { %v2129_v3 = vsub.f32 %v2117_v61, %v2127_v2 }
 0xfb8   :  { %v2128_v6 = vsub.f32 %v2116_v62, %v2126_v5 }
 0xfb9   :  { %v2131_v7 = vmul.f32 %v2129_v3, %v2129_v3 }
 0xfba   :  { %v2130_v8 = vmul.f32 %v2128_v6, %v2128_v6 }
 0xfbb   :  { %v2135_v9 = vsel %vm126_vm0, %v2131_v7, 0.0 }
 0xfbc   :  { %2136 = vadd.xlane.f32.xlu1 %v2135_v9  ;;  %v2132_v10 = vsel %vm126_vm0, %v2130_v8, 0.0 }
 0xfbd   :  { %2133 = vadd.xlane.f32.xlu0 %v2132_v10 }
0x1049   :  { %v2137_v20 = vpop.xlane.xlu1 %2136 }
0x104a   :  { %v2139_v21 = vmul.f32 0.03125, %v2137_v20  ;;  %v2134_v22 = vpop.xlane.xlu0 %2133 }
0x104b   :  { %v2138_v23 = vmul.f32 0.03125, %v2134_v22 }
0x104c   :  { %v2141_v24 = vadd.f32 1e-05, %v2139_v21 }
0x104d   :  { %v2140_v25 = vadd.f32 1e-05, %v2138_v23 }
0x104e   :  { %5397 = vrsqrt.f32 %v2141_v24 }
0x104f   :  { %5399 = vrsqrt.f32 %v2140_v25 }
0x1058   :  { %v5398_v26 = vpop.eup %5397 }
0x1059   :  { %v5400_v28 = vpop.eup %5399  ;;  %v2145_v29 = vmul.f32 %v5398_v26, %v2129_v3 }
0x105a   :  { %v2144_v30 = vmul.f32 %v5400_v28, %v2128_v6 }
0x105b   :  { %v2153_v32 = vmul.f32 %v4703_v27, %v2145_v29 }
0x105c   :  { %v2152_v33 = vmul.f32 %v4703_v27, %v2144_v30 }
0x105d   :  { %v5891_v36 = vadd.f32 %v4704_v31, %v2153_v32 }
0x105e   :  { %v5889_v34 = vadd.f32 %v4704_v31, %v2152_v33 }
0x1060   :  { %5087 = vmatprep.mubr.msk.f32.mxu1 %vm126_vm0, %v5889_v34 }
0x1061   :  { %5088 = vmatmul.mubr.msk.f32.vlgmr.msra.gmra.mrb[22].mxu1 %vm126_vm0, %v5891_v36 }
0x1062   :  { %5092 = vmatprep.mubr.msk.f32.mxu1 %vm5446_vm1, %v5445_v13 }
0x1134   :  { %v5089_v38 = vpop.f32.mrb[22].mxu1 }
0x1135   :  { %v5902_v39 = vadd.f32 %v5089_v38, %v4710_v37  ;;  %v2247_v41 = vpop.f32.mrb[23].mxu1 }
0x1136   :  { %v5904_v42 = vadd.f32 %v4710_v37, %v2247_v41 }
0x1137   :  { %2339 = vrot.lane.b32.xlu1 %v5902_v39, %s6286_s27 }
0x1138   :  { %2262 = vrot.lane.b32.xlu0 %v5904_v42, %s6286_s27 }
0x11a9   :  { %v2340_v44 = vpop.permute.xlu1 %2339 }
0x11aa   :  { %v2263_v43 = vpop.permute.xlu0 %2262 }
0x11ab   :  { %5091 = vmatpush3.xpose.msk.msra.mxu1 %vm225_vm2, %v2263_v43 }
0x11ac   :  { %5095 = vmatprep.subr.mxu1 %v5445_v13 }
0x11ae   :  { %5093 = vmatmul.mubr.msk.f32.vlgmr.msra.gmra.mrb[24].mxu1 %vm225_vm2, %v5904_v42 }
0x11af   :  { %5096 = vmatpush3.xpose.msk.msra.mxu1 %vm225_vm2, %v2340_v44  ;;  %5097 = vmatprep.mubr.msk.f32.mxu1 %vm5446_vm1, %v5445_v13 }
0x11b0   :  { %5105 = vmatprep.subr.mxu1 %v5445_v13 }
0x11b2   :  { %5098 = vmatmul.mubr.msk.f32.vlgmr.msra.gmra.mrb[26].mxu1 %vm225_vm2, %v5902_v39 }
0x11b3   :  { %5107 = vmatprep.mubr.msk.f32.mxu1 %vm5446_vm1, %v5445_v13 }
0x1281   :  { %v2334_v45 = vpop.f32.mrb[24].mxu1 }
0x1282   :  { %v5094_v46 = vpop.f32.mrb[25].mxu1  ;;  %v2335_v55 = vadd.f32 %v2334_v45, %v5657_v35 }
0x1284   :  { %v2415_v56 = vsel %vm225_vm2, %v2335_v55, -inf }
0x1285   :  { %v2411_v47 = vpop.f32.mrb[26].mxu1 }
0x1286   :  { %v2412_v48 = vadd.f32 %v2411_v47, %v5660_v40  ;;  %v5099_v49 = vpop.f32.mrb[27].mxu1 }
0x1288   :  { %v2418_v17 = vsel %vm225_vm2, %v2412_v48, -inf }
0x1289   :  { %2419 = vmax.xlane.f32.xlu1 %v2418_v17 }
0x129a   :  { %2669 = vrot.lane.b32.xlu1 %v5902_v39, %s6287_s4 }
0x129e   :  { %2667 = vrot.lane.b32.xlu1 %v5902_v39, %s6288_s30 }
0x1316   :  { %v2420_v50 = vpop.xlane.xlu1 %2419 }
0x1317   :  { %v2422_v51 = vsub.f32 %v2412_v48, %v2420_v50 }
0x1319   :  { %v2425_v52 = vmul.f32 1.442695, %v2422_v51 }
0x131a   :  { %v2670_v59 = vpop.permute.xlu1 %2669 }
0x131b   :  { %5401 = vpow2.f32 %v2425_v52 }
0x131e   :  { %v2668_v61 = vpop.permute.xlu1 %2667 }
0x1325   :  { %v5402_v53 = vpop.eup %5401 }
0x1326   :  { %v2430_v54 = vsel %vm225_vm2, %v5402_v53, 0.0 }
0x1327   :  { %2431 = vadd.xlane.f32.xlu0 %v2430_v54 }
0x133d   :  { %2513 = vrot.lane.b32.xlu0 %v5902_v39, %s6289_s25 }
0x135c   :  { %2416 = vmax.xlane.f32.xlu0 %v2415_v56 }
0x1372   :  { %2437 = vrot.lane.b32.xlu0 %v5904_v42, %s6289_s25 }
0x1376   :  { %2589 = vrot.lane.b32.xlu0 %v5904_v42, %s6288_s30 }
0x13b4   :  { %v2432_v18 = vpop.xlane.xlu0 %2431 }
0x13b5   :  { %5403 = vrcp.f32 %v2432_v18 }
0x13b8   :  { %v2514_v57 = vpop.permute.xlu0 %2513 }
0x13b9   :  { %5106 = vmatpush3.msra.mxu1 %v2514_v57 }
0x13ba   :  { %5115 = vmatprep.subr.mxu1 %v5445_v13 }
0x13bf   :  { %v5404_v58 = vpop.eup %5403 }
0x13c0   :  { %v2436_v60 = vmul.f32 %v5404_v58, %v5402_v53 }
0x13c2   :  { %5108 = vmatmul.mubr.msk.f32.vlgmr.msra.gmra.mrb[28].mxu1 %vm225_vm2, %v2436_v60  ;;  %v4714_v60 = vld [vmem:[%s6281_s28 + $0x28] sm:$0xff] }
0x13c3   :  { %5116 = vmatpush3.xpose.msk.msra.mxu1 %vm225_vm2, %v2670_v59  ;;  %5117 = vmatprep.mubr.msk.f32.mxu1 %vm5446_vm1, %v5445_v13 }
0x13c4   :  { %5125 = vmatprep.subr.mxu1 %v5445_v13 }
0x13c6   :  { %5118 = vmatmul.mubr.msk.f32.vlgmr.msra.gmra.mrb[30].mxu1 %vm225_vm2, %v2668_v61  ;;  %v4713_v61 = vld [vmem:[%s6281_s28 + $0x20] sm:$0xff] }
0x13c7   :  { %5127 = vmatprep.mubr.msk.f32.mxu1 %vm5446_vm1, %v5445_v13 }
0x13e9   :  { %v2417_v62 = vpop.xlane.xlu0 %2416 }
0x13ea   :  { %v2421_v63 = vsub.f32 %v2335_v55, %v2417_v62 }
0x13ec   :  { %v2423_v0 = vmul.f32 1.442695, %v2421_v63 }
0x13ed   :  { %v2438_v1 = vpop.permute.xlu0 %2437 }
0x13ee   :  { %5405 = vpow2.f32 %v2423_v0  ;;  %5101 = vmatpush3.msra.mxu0 %v2438_v1 }
0x13ef   :  { %5110 = vmatprep.subr.mxu0 %v5445_v13 }
0x13f1   :  { %v2590_v10 = vpop.permute.xlu0 %2589 }
0x13f8   :  { %v5406_v2 = vpop.eup %5405 }
0x13f9   :  { %v2427_v4 = vsel %vm225_vm2, %v5406_v2, 0.0 }
0x13fa   :  { %2428 = vadd.xlane.f32.xlu1 %v2427_v4 }
0x140b   :  { %2591 = vrot.lane.b32.xlu1 %v5904_v42, %s6287_s4 }
0x1487   :  { %v2429_v5 = vpop.xlane.xlu1 %2428 }
0x1488   :  { %5407 = vrcp.f32 %v2429_v5 }
0x148b   :  { %v2592_v7 = vpop.permute.xlu1 %2591 }
0x1492   :  { %v5408_v3 = vpop.eup %5407 }
0x1493   :  { %v2435_v6 = vmul.f32 %v5408_v3, %v5406_v2 }
0x1495   :  { %5103 = vmatmul.mubr.msk.f32.vlgmr.msra.gmra.mrb[18].mxu0 %vm225_vm2, %v2435_v6  ;;  %v5951_v8 = vpop.f32.mrb[28].mxu1 }
0x1496   :  { %5111 = vmatpush3.xpose.msk.msra.mxu0 %vm225_vm2, %v2592_v7  ;;  %v5109_v9 = vpop.f32.mrb[29].mxu1  ;;  %5112 = vmatprep.mubr.msk.f32.mxu0 %vm5446_vm1, %v5445_v13 }
0x1497   :  { %5120 = vmatprep.subr.mxu0 %v5445_v13 }
0x1499   :  { %5113 = vmatmul.mubr.msk.f32.vlgmr.msra.gmra.mrb[20].mxu0 %vm225_vm2, %v2590_v10  ;;  %v2741_v12 = vpop.f32.mrb[30].mxu1 }
0x149a   :  { %v2742_v11 = vadd.f32 %v2741_v12, %v5660_v40  ;;  %v5119_v14 = vpop.f32.mrb[31].mxu1  ;;  %5122 = vmatprep.mubr.msk.f32.mxu0 %vm5446_vm1, %v5445_v13  ;;  %v4715_v12 = vld [vmem:[%s6281_s28 + $0x30] sm:$0xff] }
0x149c   :  { %v2748_v15 = vsel %vm225_vm2, %v2742_v11, -inf }
0x149d   :  { %2749 = vmax.xlane.f32.xlu1 %v2748_v15 }
0x14ae   :  { %3083 = vrot.lane.b32.xlu1 %v5904_v42, %s6290_s26 }
0x14b2   :  { %3081 = vrot.lane.b32.xlu1 %v5904_v42, %s6291_s3 }
0x14b6   :  { %3159 = vrot.lane.b32.xlu1 %v5902_v39, %s6291_s3  ;;  %s6296_s3 = smov 40  }
0x152a   :  { %v2750_v16 = vpop.xlane.xlu1 %2749 }
0x152b   :  { %v2752_v19 = vsub.f32 %v2742_v11, %v2750_v16 }
0x152d   :  { %v2755_v20 = vmul.f32 1.442695, %v2752_v19 }
0x152e   :  { %v3084_v31 = vpop.permute.xlu1 %3083 }
0x152f   :  { %5409 = vpow2.f32 %v2755_v20 }
0x1532   :  { %v3082_v37 = vpop.permute.xlu1 %3081 }
0x1536   :  { %v3160_v41 = vpop.permute.xlu1 %3159 }
0x1539   :  { %v5410_v21 = vpop.eup %5409 }
0x153a   :  { %v2760_v22 = vsel %vm225_vm2, %v5410_v21, 0.0 }
0x153b   :  { %2761 = vadd.xlane.f32.xlu0 %v2760_v22 }
0x1551   :  { %2843 = vrot.lane.b32.xlu0 %v5902_v39, %s6292_s5 }
0x1555   :  { %3161 = vrot.lane.b32.xlu0 %v5902_v39, %s6290_s26 }
0x1568   :  { %v5973_v23 = vpop.f32.mrb[18].mxu0 }
0x1569   :  { %v5104_v24 = vpop.f32.mrb[19].mxu0 }
0x156c   :  { %v2663_v25 = vpop.f32.mrb[20].mxu0 }
0x156d   :  { %v5114_v26 = vpop.f32.mrb[21].mxu0  ;;  %v2664_v27 = vadd.f32 %v2663_v25, %v5657_v35 }
0x156f   :  { %v2745_v28 = vsel %vm225_vm2, %v2664_v27, -inf }
0x1574   :  { %2746 = vmax.xlane.f32.xlu0 %v2745_v28 }
0x158a   :  { %2767 = vrot.lane.b32.xlu0 %v5904_v42, %s6292_s5 }
0x158e   :  { %3259 = vrot.lane.b32.xlu0 %v5904_v42, %s6293_s6 }
0x1592   :  { %3496 = vrot.lane.b32.xlu0 %v5904_v42, %s6294_s0 }
0x1596   :  { %3574 = vrot.lane.b32.xlu0 %v5902_v39, %s6294_s0 }
0x159a   :  { %3494 = vrot.lane.b32.xlu0 %v5904_v42, %s6295_s11 }
0x159e   :  { %3572 = vrot.lane.b32.xlu0 %v5902_v39, %s6295_s11 }
0x15c8   :  { %v2762_v29 = vpop.xlane.xlu0 %2761 }
0x15c9   :  { %5411 = vrcp.f32 %v2762_v29 }
0x15cc   :  { %v2844_v30 = vpop.permute.xlu0 %2843 }
0x15cd   :  { %5126 = vmatpush3.msra.mxu1 %v2844_v30 }
0x15ce   :  { %5140 = vmatprep.subr.mxu1 %v5445_v13 }
0x15d0   :  { %v3162_v38 = vpop.permute.xlu0 %3161 }
0x15d3   :  { %v5412_v32 = vpop.eup %5411 }
0x15d4   :  { %v2766_v33 = vmul.f32 %v5412_v32, %v5410_v21 }
0x15d6   :  { %5128 = vmatmul.mubr.msk.f32.vlgmr.msra.gmra.mrb[32].mxu1 %vm225_vm2, %v2766_v33 }
0x15d7   :  { %5141 = vmatpush3.xpose.msk.msra.mxu1 %vm225_vm2, %v3084_v31  ;;  %5142 = vmatprep.mubr.msk.f32.mxu1 %vm5446_vm1, %v5445_v13 }
0x15d8   :  { %5145 = vmatprep.subr.mxu1 %v5445_v13 }
0x15da   :  { %5143 = vmatmul.mubr.msk.f32.vlgmr.msra.gmra.mrb[34].mxu1 %vm225_vm2, %v3082_v37 }
0x15db   :  { %5146 = vmatpush3.xpose.msk.msra.mxu1 %vm225_vm2, %v3162_v38  ;;  %5147 = vmatprep.mubr.msk.f32.mxu1 %vm5446_vm1, %v5445_v13 }
0x15dc   :  { %5155 = vmatprep.subr.mxu1 %v5445_v13 }
0x15de   :  { %5148 = vmatmul.mubr.msk.f32.vlgmr.msra.gmra.mrb[36].mxu1 %vm225_vm2, %v3160_v41 }
0x15df   :  { %5157 = vmatprep.mubr.msk.f32.mxu1 %vm5446_vm1, %v5445_v13 }
0x1601   :  { %v2747_v43 = vpop.xlane.xlu0 %2746 }
0x1602   :  { %v2751_v44 = vsub.f32 %v2664_v27, %v2747_v43 }
0x1604   :  { %v2753_v45 = vmul.f32 1.442695, %v2751_v44 }
0x1605   :  { %v2768_v46 = vpop.permute.xlu0 %2767 }
0x1606   :  { %5413 = vpow2.f32 %v2753_v45  ;;  %5121 = vmatpush3.msra.mxu0 %v2768_v46 }
0x1607   :  { %5130 = vmatprep.subr.mxu0 %v4714_v60 }
0x1609   :  { %v3260_v11 = vpop.permute.xlu0 %3259 }
0x160d   :  { %v3497_v19 = vpop.permute.xlu0 %3496 }
0x1610   :  { %v5414_v47 = vpop.eup %5413 }
0x1611   :  { %v2757_v48 = vsel %vm225_vm2, %v5414_v47, 0.0 }
0x1612   :  { %2758 = vadd.xlane.f32.xlu1 %v2757_v48 }
0x169f   :  { %v2759_v49 = vpop.xlane.xlu1 %2758 }
0x16a0   :  { %5415 = vrcp.f32 %v2759_v49 }
0x16a9   :  { %v2915_v17 = vpop.f32.mrb[32].mxu1 }
0x16aa   :  { %v5416_v50 = vpop.eup %5415  ;;  %v5129_v51 = vpop.f32.mrb[33].mxu1 }
0x16ab   :  { %v2765_v52 = vmul.f32 %v5416_v50, %v5414_v47 }
0x16ad   :  { %5123 = vmatmul.mubr.msk.f32.vlgmr.msra.gmra.mrb[22].mxu0 %vm225_vm2, %v2765_v52  ;;  %v3155_v53 = vpop.f32.mrb[34].mxu1 }
0x16ae   :  { %v3156_v54 = vadd.f32 %v3155_v53, %v5657_v35  ;;  %v5144_v55 = vpop.f32.mrb[35].mxu1  ;;  %5131 = vmatpush3.msra.mxu0 %v4714_v60 }
0x16af   :  { %5135 = vmatprep.subr.mxu0 %v4713_v61  ;;  %v4716_v55 = vld [vmem:[%s6281_s28 + $0x38] sm:$0xff] }
0x16b0   :  { %v3237_v56 = vsel %vm225_vm2, %v3156_v54, -inf }
0x16b1   :  { %3238 = vmax.xlane.f32.xlu1 %v3237_v56  ;;  %v3233_v18 = vpop.f32.mrb[36].mxu1 }
0x16b2   :  { %v3234_v57 = vadd.f32 %v3233_v18, %v5660_v40  ;;  %v5149_v58 = vpop.f32.mrb[37].mxu1 }
0x16b4   :  { %v3240_v59 = vsel %vm225_vm2, %v3234_v57, -inf }
0x16b5   :  { %3241 = vmax.xlane.f32.xlu1 %v3240_v59 }
0x173e   :  { %v3239_v62 = vpop.xlane.xlu1 %3238 }
0x173f   :  { %v3243_v63 = vsub.f32 %v3156_v54, %v3239_v62 }
0x1741   :  { %v3245_v0 = vmul.f32 1.442695, %v3243_v63 }
0x1742   :  { %v3242_v1 = vpop.xlane.xlu1 %3241 }
0x1743   :  { %5417 = vpow2.f32 %v3245_v0  ;;  %v3244_v2 = vsub.f32 %v3234_v57, %v3242_v1 }
0x1745   :  { %v3247_v4 = vmul.f32 1.442695, %v3244_v2 }
0x1747   :  { %5419 = vpow2.f32 %v3247_v4 }
0x174d   :  { %v5418_v5 = vpop.eup %5417 }
0x174e   :  { %v3249_v3 = vsel %vm225_vm2, %v5418_v5, 0.0 }
0x174f   :  { %3250 = vadd.xlane.f32.xlu1 %v3249_v3 }
0x1751   :  { %v5420_v6 = vpop.eup %5419 }
0x1752   :  { %v3252_v7 = vsel %vm225_vm2, %v5420_v6, 0.0 }
0x1753   :  { %3253 = vadd.xlane.f32.xlu1 %v3252_v7 }
0x1764   :  { %3335 = vrot.lane.b32.xlu1 %v5902_v39, %s6293_s6 }
0x1780   :  { %v2839_v9 = vpop.f32.mrb[22].mxu0 }
0x1781   :  { %v5124_v10 = vpop.f32.mrb[23].mxu0  ;;  %5132 = vmatprep.mubr.msk.f32.mxu0 %vm225_vm2, %v2839_v9 }
0x1782   :  { %5133 = vmatmul.mubr.msk.f32.vlgmr.msra.gmra.mrb[24].mxu0 %vm225_vm2, %v2915_v17 }
0x1783   :  { %5137 = vmatprep.mubr.msk.f32.mxu0 %vm225_vm2, %v5973_v23  ;;  %5136 = vmatpush3.msra.mxu0 %v4713_v61  ;;  %v4750_v61 = vld [vmem:[%s6282_s1 + $0x1] ss:$0 sm:$0xff] }
0x1784   :  { %5150 = vmatprep.subr.mxu0 %v5445_v13 }
0x178a   :  { %5138 = vmatmul.mubr.msk.f32.vlgmr.msra.gmra.mrb[24].mxu0 %vm225_vm2, %v5951_v8  ;;  %v3575_v8 = vpop.permute.xlu0 %3574 }
0x178b   :  { %5151 = vmatpush3.msra.mxu0 %v3260_v11  ;;  %5152 = vmatprep.mubr.msk.f32.mxu0 %vm5446_vm1, %v5445_v13 }
0x178c   :  { %5160 = vmatprep.subr.mxu0 %v4715_v12 }
0x178e   :  { %v3495_v24 = vpop.permute.xlu0 %3494 }
0x1792   :  { %v3573_v29 = vpop.permute.xlu0 %3572 }
0x17dc   :  { %v3251_v14 = vpop.xlane.xlu1 %3250 }
0x17dd   :  { %5421 = vrcp.f32 %v3251_v14 }
0x17e0   :  { %v3254_v15 = vpop.xlane.xlu1 %3253 }
0x17e1   :  { %5423 = vrcp.f32 %v3254_v15 }
0x17e4   :  { %v3336_v16 = vpop.permute.xlu1 %3335 }
0x17e5   :  { %5156 = vmatpush3.msra.mxu1 %v3336_v16 }
0x17e6   :  { %5165 = vmatprep.subr.mxu1 %v5445_v13 }
0x17e7   :  { %v5422_v20 = vpop.eup %5421 }
0x17e8   :  { %v3257_v21 = vmul.f32 %v5422_v20, %v5418_v5 }
0x17ea   :  { %5153 = vmatmul.mubr.msk.f32.vlgmr.msra.gmra.mrb[26].mxu0 %vm225_vm2, %v3257_v21  ;;  %v4757_v21 = vld [vmem:[%s6283_s9 + $0x30] sm:$0xff] }
0x17eb   :  { %v5424_v22 = vpop.eup %5423  ;;  %5161 = vmatpush3.msra.mxu0 %v4715_v12 }
0x17ec   :  { %v3258_v23 = vmul.f32 %v5424_v22, %v5420_v6  ;;  %5170 = vmatprep.subr.mxu0 %v5445_v13  ;;  %v4758_v22 = vld [vmem:[%s6283_s9 + $0x38] sm:$0xff] }
0x17ee   :  { %5158 = vmatmul.mubr.msk.f32.vlgmr.msra.gmra.mrb[38].mxu1 %vm225_vm2, %v3258_v23  ;;  %v4763_v23 = vld [vmem:[%s6284_s7 + $0x40] sm:$0xff] }
0x17ef   :  { %5166 = vmatpush3.xpose.msk.msra.mxu1 %vm225_vm2, %v3497_v19  ;;  %5167 = vmatprep.mubr.msk.f32.mxu1 %vm5446_vm1, %v5445_v13  ;;  %v4756_v19 = vld [vmem:[%s6283_s9 + $0x28] sm:$0xff] }
0x17f0   :  { %5175 = vmatprep.subr.mxu1 %v5445_v13 }
0x17f2   :  { %5168 = vmatmul.mubr.msk.f32.vlgmr.msra.gmra.mrb[40].mxu1 %vm225_vm2, %v3495_v24  ;;  %v4764_v24 = vld [vmem:[%s6284_s7 + $0x48] sm:$0xff] }
0x17f3   :  { %5177 = vmatprep.mubr.msk.f32.mxu1 %vm5446_vm1, %v5445_v13 }
0x18bd   :  { %v3331_v25 = vpop.f32.mrb[26].mxu0 }
0x18be   :  { %v5154_v26 = vpop.f32.mrb[27].mxu0  ;;  %5162 = vmatprep.mubr.msk.f32.mxu0 %vm225_vm2, %v3331_v25  ;;  %v4765_v25 = vld [vmem:[%s6284_s7 + $0x50] sm:$0xff] }
0x18bf   :  { %v5305_v26 = vpack.c.bf16 %v4764_v24, %v4763_v23 }
0x18c1   :  { %v3407_v27 = vpop.f32.mrb[38].mxu1 }
0x18c2   :  { %v5159_v28 = vpop.f32.mrb[39].mxu1  ;;  %5163 = vmatmul.mubr.msk.f32.vlgmr.msra.gmra.mrb[24].mxu0 %vm225_vm2, %v3407_v27  ;;  %v4766_v27 = vld [vmem:[%s6284_s7 + $0x58] sm:$0xff] }
0x18c3   :  { %5171 = vmatpush3.xpose.msk.msra.mxu0 %vm225_vm2, %v3575_v8  ;;  %5172 = vmatprep.mubr.msk.f32.mxu0 %vm5446_vm1, %v5445_v13  ;;  %v5301_v8 = vpack.c.bf16 %v4758_v22, %v4757_v21  ;;  %v5309_v28 = vpack.c.bf16 %v4766_v27, %v4765_v25 }
0x18c4   :  { %5180 = vmatprep.subr.mxu0 %v5445_v13 }
0x18c5   :  { %v3568_v30 = vpop.f32.mrb[40].mxu1 }
0x18c6   :  { %v3569_v31 = vadd.f32 %v3568_v30, %v5657_v35  ;;  %v5169_v32 = vpop.f32.mrb[41].mxu1  ;;  %5173 = vmatmul.mubr.msk.f32.vlgmr.msra.gmra.mrb[28].mxu0 %vm225_vm2, %v3573_v29  ;;  %v4767_v29 = vld [vmem:[%s6284_s7 + $0x60] sm:$0xff]  ;;  %v4768_v30 = vld [vmem:[%s6284_s7 + $0x68] sm:$0xff] }
0x18c7   :  { %5182 = vmatprep.mubr.msk.f32.mxu0 %vm5446_vm1, %v5445_v13 }
0x18c8   :  { %v3650_v33 = vsel %vm225_vm2, %v3569_v31, -inf }
0x18c9   :  { %3651 = vmax.xlane.f32.xlu1 %v3650_v33 }
0x1956   :  { %v3652_v37 = vpop.xlane.xlu1 %3651 }
0x1957   :  { %v3656_v38 = vsub.f32 %v3569_v31, %v3652_v37  ;;  %v5313_v31 = vpack.c.bf16 %v4768_v30, %v4767_v29 }
0x1959   :  { %v3658_v41 = vmul.f32 1.442695, %v3656_v38 }
0x195b   :  { %5425 = vpow2.f32 %v3658_v41 }
0x1965   :  { %v5426_v35 = vpop.eup %5425 }
0x1966   :  { %v3662_v47 = vsel %vm225_vm2, %v5426_v35, 0.0 }
0x1999   :  { %v3646_v43 = vpop.f32.mrb[28].mxu0 }
0x199a   :  { %v3647_v44 = vadd.f32 %v3646_v43, %v5660_v40  ;;  %v5174_v45 = vpop.f32.mrb[29].mxu0 }
0x199b   :  { %v4753_v45 = vld [vmem:[%s6285_s2 + $0x1] ss:$0 sm:$0xff] }
0x199c   :  { %v3653_v46 = vsel %vm225_vm2, %v3647_v44, -inf }
0x199d   :  { %3654 = vmax.xlane.f32.xlu0 %v3653_v46 }
0x19a1   :  { %3663 = vadd.xlane.f32.xlu0 %v3662_v47 }
0x19b7   :  { %3672 = vrot.lane.b32.xlu0 %v5904_v42, %s6296_s3 }
0x1a2a   :  { %v3655_v48 = vpop.xlane.xlu0 %3654 }
0x1a2b   :  { %v3657_v49 = vsub.f32 %v3647_v44, %v3655_v48  ;;  %v4754_v48 = vld [vmem:[%s6219_s8 + $0x1] ss:$0 sm:$0xff] }
0x1a2d   :  { %v3660_v17 = vmul.f32 1.442695, %v3657_v49 }
0x1a2e   :  { %v3664_v50 = vpop.xlane.xlu0 %3663 }
0x1a2f   :  { %5427 = vpow2.f32 %v3660_v17 }
0x1a30   :  { %5429 = vrcp.f32 %v3664_v50 }
0x1a32   :  { %v3673_v51 = vpop.permute.xlu0 %3672 }
0x1a33   :  { %5176 = vmatpush3.msra.mxu1 %v3673_v51 }
0x1a39   :  { %v5428_v40 = vpop.eup %5427 }
0x1a3a   :  { %v5430_v52 = vpop.eup %5429  ;;  %v3665_v53 = vsel %vm225_vm2, %v5428_v40, 0.0 }
0x1a3b   :  { %v3670_v54 = vmul.f32 %v5430_v52, %v5426_v35  ;;  %3666 = vadd.xlane.f32.xlu1 %v3665_v53  ;;  %v4770_v52 = vld [vmem:[%s6284_s7 + $0x78] sm:$0xff] }
0x1a3d   :  { %5178 = vmatmul.mubr.msk.f32.vlgmr.msra.gmra.mrb[42].mxu1 %vm225_vm2, %v3670_v54  ;;  %v4760_v54 = vld [vmem:[%s6220_s10 + $0x1] ss:$0 sm:$0xff] }
0x1a4c   :  { %3748 = vrot.lane.b32.xlu1 %v5902_v39, %s6296_s3 }
0x1ac8   :  { %v3667_v42 = vpop.xlane.xlu1 %3666 }
0x1ac9   :  { %5431 = vrcp.f32 %v3667_v42 }
0x1acc   :  { %v3749_v56 = vpop.permute.xlu1 %3748 }
0x1acd   :  { %5181 = vmatpush3.msra.mxu0 %v3749_v56 }
0x1ace   :  { %5185 = vmatprep.subr.mxu0 %v4716_v55 }
0x1ad3   :  { %v5432_v18 = vpop.eup %5431 }
0x1ad4   :  { %v3671_v57 = vmul.f32 %v5432_v18, %v5428_v40  ;;  %v4769_v40 = vld [vmem:[%s6284_s7 + $0x70] sm:$0xff] }
0x1ad5   :  { %v5317_v53 = vpack.c.bf16 %v4770_v52, %v4769_v40 }
0x1ad6   :  { %5183 = vmatmul.mubr.msk.f32.vlgmr.msra.gmra.mrb[30].mxu0 %vm225_vm2, %v3671_v57 }
0x1ad7   :  { %5186 = vmatpush3.msra.mxu0 %v4716_v55 }
0x1ad8   :  { %5306 = vmatprep.subr.bf16.mxu0 %v5305_v26 }
0x1b10   :  { %v3744_v58 = vpop.f32.mrb[42].mxu1 }
0x1b11   :  { %v5179_v59 = vpop.f32.mrb[43].mxu1  ;;  %5187 = vmatprep.mubr.msk.f32.mxu0 %vm225_vm2, %v3744_v58 }
0x1b12   :  { %v4772_v59 = vld [vmem:[%s6221_s12 + $0x1] ss:$0 sm:$0xff] }
0x1ba9   :  { %v3820_v60 = vpop.f32.mrb[30].mxu0 }
0x1baa   :  { %v5184_v39 = vpop.f32.mrb[31].mxu0  ;;  %5188 = vmatmul.mubr.msk.f32.vlgmr.msra.gmra.mrb[24].mxu0 %vm225_vm2, %v3820_v60 }
0x1bab   :  { %5308 = vmatpush3.bf16.msra.mxu0 %v5305_v26 }
0x1bac   :  { %5310 = vmatprep.subr.bf16.mxu0 %v5309_v28 }
0x1baf   :  { %5312 = vmatpush3.bf16.msra.mxu0 %v5309_v28  ;;  %v4777_v28 = vld [vmem:[%s6222_s13 + $0x1] ss:$0 sm:$0xff] }
0x1bb0   :  { %5314 = vmatprep.subr.bf16.mxu0 %v5313_v31 }
0x1bb3   :  { %5316 = vmatpush3.bf16.msra.mxu0 %v5313_v31  ;;  %v4778_v31 = vld [vmem:[%s6223_s14 + $0x1] ss:$0 sm:$0xff] }
0x1bb4   :  { %5318 = vmatprep.subr.bf16.mxu0 %v5317_v53 }
0x1bb7   :  { %5320 = vmatpush3.bf16.msra.mxu0 %v5317_v53  ;;  %v4312_v53 = vld [vmem:[%s6225_s17] sm:$0xff] }
0x1bb8   :  { %5242 = vmatprep.subr.mxu0 %v5445_v13 }
0x1c7d   :  { %v5189_v62 = vpop.f32.mrb[24].mxu0 }
0x1c7e   :  { %v3916_v63 = vadd.f32 %v5189_v62, %v4750_v61  ;;  %v3896_v0 = vpop.f32.mrb[25].mxu0 }
0x1c7f   :  { %v3915_v1 = vadd.f32 %v4750_v61, %v3896_v0 }
0x1c80   :  { %v3918_v2 = vadd.f32 %v3916_v63, %v5891_v36 }
0x1c81   :  { %v3917_v4 = vadd.f32 %v3915_v1, %v5889_v34  ;;  %v4755_v34 = vld [vmem:[%s6283_s9 + $0x20] sm:$0xff] }
0x1c82   :  { %v3926_v5 = vsel %vm126_vm0, %v3918_v2, 0.0  ;;  %v5297_v20 = vpack.c.bf16 %v4756_v19, %v4755_v34  ;;  %v4226_v34 = vld [vmem:[%s6224_s15 + $0x10] sm:$0xff] }
0x1c83   :  { %3927 = vadd.xlane.f32.xlu0 %v3926_v5  ;;  %v3923_v3 = vsel %vm126_vm0, %v3917_v4, 0.0 }
0x1c84   :  { %3924 = vadd.xlane.f32.xlu1 %v3923_v3  ;;  %5298 = vmatprep.subr.bf16.mxu1 %v5297_v20 }
0x1c85   :  { %5300 = vmatpush3.bf16.msra.mxu1 %v5297_v20  ;;  %v4227_v20 = vld [vmem:[%s6224_s15 + $0x18] sm:$0xff] }
0x1c86   :  { %5302 = vmatprep.subr.bf16.mxu1 %v5301_v8  ;;  %v5325_v21 = vpack.c.bf16 %v4227_v20, %v4226_v34 }
0x1c89   :  { %5304 = vmatpush3.bf16.msra.mxu1 %v5301_v8 }
0x1d10   :  { %v3928_v6 = vpop.xlane.xlu0 %3927 }
0x1d11   :  { %v3930_v7 = vmul.f32 0.03125, %v3928_v6  ;;  %v3925_v9 = vpop.xlane.xlu1 %3924 }
0x1d12   :  { %v3929_v10 = vmul.f32 0.03125, %v3925_v9 }
0x1d13   :  { %v3932_v12 = vsub.f32 %v3918_v2, %v3930_v7 }
0x1d14   :  { %v3931_v11 = vsub.f32 %v3917_v4, %v3929_v10 }
0x1d15   :  { %v3934_v14 = vmul.f32 %v3932_v12, %v3932_v12 }
0x1d16   :  { %v3933_v15 = vmul.f32 %v3931_v11, %v3931_v11 }
0x1d17   :  { %v3938_v16 = vsel %vm126_vm0, %v3934_v14, 0.0 }
0x1d18   :  { %3939 = vadd.xlane.f32.xlu1 %v3938_v16  ;;  %v3935_v36 = vsel %vm126_vm0, %v3933_v15, 0.0  ;;  %v5460_v15 = vmov 0.0|0.0   ;;  %v4224_v16 = vld [vmem:[%s6224_s15] sm:$0xff] }
0x1d19   :  { %3936 = vadd.xlane.f32.xlu0 %v3935_v36  ;;  %5321 = vmatprep.subr.bf16.mxu1 %v5460_v15  ;;  %v4225_v36 = vld [vmem:[%s6224_s15 + $0x8] sm:$0xff] }
0x1d1a   :  { %v5322_v19 = vpack.c.bf16 %v4225_v36, %v4224_v16  ;;  %v4785_v16 = vld [vmem:[%s6233_s22] ss:$0 sm:$0xff] }
0x1da5   :  { %v3940_v32 = vpop.xlane.xlu1 %3939 }
0x1da6   :  { %v3942_v33 = vmul.f32 0.03125, %v3940_v32  ;;  %v3937_v37 = vpop.xlane.xlu0 %3936 }
0x1da7   :  { %v3941_v38 = vmul.f32 0.03125, %v3937_v37 }
0x1da8   :  { %v3944_v41 = vadd.f32 1e-05, %v3942_v33 }
0x1da9   :  { %v3943_v43 = vadd.f32 1e-05, %v3941_v38 }
0x1daa   :  { %5433 = vrsqrt.f32 %v3944_v41 }
0x1dab   :  { %5435 = vrsqrt.f32 %v3943_v43 }
0x1db4   :  { %v5434_v44 = vpop.eup %5433 }
0x1db5   :  { %v5436_v46 = vpop.eup %5435  ;;  %v3948_v35 = vmul.f32 %v5434_v44, %v3932_v12 }
0x1db6   :  { %v3947_v47 = vmul.f32 %v5436_v46, %v3931_v11 }
0x1db7   :  { %v3956_v49 = vmul.f32 %v4753_v45, %v3948_v35 }
0x1db8   :  { %v3955_v17 = vmul.f32 %v4753_v45, %v3947_v47 }
0x1db9   :  { %v3964_v51 = vadd.f32 %v4754_v48, %v3956_v49 }
0x1dba   :  { %v3963_v50 = vadd.f32 %v4754_v48, %v3955_v17 }
0x1dbc   :  { %5198 = vmatprep.mubr.msk.f32.mxu1 %vm126_vm0, %v3963_v50 }
0x1dbd   :  { %5199 = vmatmul.mubr.msk.f32.vlgmr.msra.gmra.mrb[44].mxu1 %vm126_vm0, %v3964_v51 }
0x1dbe   :  { %5228 = vmatprep.mubr.msk.f32.mxu1 %vm5446_vm1, %v5445_v13  ;;  %5323 = vmatpush3.bf16.msra.mxu1 %v5322_v19 }
0x1dbf   :  { %5324 = vmatprep.subr.bf16.mxu1 %v5460_v15 }
0x1dc2   :  { %5326 = vmatpush3.bf16.msra.mxu1 %v5325_v21 }
0x1dc3   :  { %5327 = vmatprep.subr.bf16.mxu1 %v5460_v15 }
0x1e90   :  { %v5200_v42 = vpop.f32.mrb[44].mxu1 }
0x1e91   :  { %v4056_v55 = vadd.f32 %v5200_v42, %v4760_v54  ;;  %v4050_v56 = vpop.f32.mrb[45].mxu1 }
0x1e92   :  { %v4051_v18 = vadd.f32 %v4760_v54, %v4050_v56  ;;  %v4313_v54 = vld [vmem:[%s6225_s17 + $0x8] sm:$0xff] }
0x1e93   :  { %v4060_v58 = vmax.f32 %v4056_v55, 0.0 }
0x1e94   :  { %v4059_v57 = vmax.f32 %v4051_v18, 0.0  ;;  %v5328_v18 = vpack.c.bf16 %v4313_v54, %v4312_v53 }
0x1e96   :  { %5217 = vmatprep.mubr.msk.f32.mxu0 %vm2034_vm4, %v4059_v57 }
0x1e97   :  { %5218 = vmatmul.mubr.msk.f32.vlgmr.msra.gmra.mrb[32].mxu0 %vm2034_vm4, %v4060_v58  ;;  %v4314_v58 = vld [vmem:[%s6225_s17 + $0x10] sm:$0xff] }
0x1e98   :  { %5244 = vmatprep.mubr.msk.f32.mxu0 %vm5446_vm1, %v5445_v13 }
0x1f6a   :  { %v5219_v60 = vpop.f32.mrb[32].mxu0 }
0x1f6b   :  { %v4156_v39 = vadd.f32 %v5219_v60, %v4772_v59  ;;  %v4150_v61 = vpop.f32.mrb[33].mxu0 }
0x1f6c   :  { %v4151_v62 = vadd.f32 %v4772_v59, %v4150_v61  ;;  %v4315_v59 = vld [vmem:[%s6225_s17 + $0x18] sm:$0xff] }
0x1f6d   :  { %v4160_v63 = vadd.f32 %v4156_v39, %v3964_v51  ;;  %v5331_v60 = vpack.c.bf16 %v4315_v59, %v4314_v58  ;;  %v4779_v39 = vld [vmem:[%s6226_s16] ss:$0 sm:$0xff] }
0x1f6e   :  { %v4159_v0 = vadd.f32 %v4151_v62, %v3963_v50 }
0x1f6f   :  { %v4168_v1 = vsel %vm126_vm0, %v4160_v63, 0.0 }
0x1f70   :  { %4169 = vadd.xlane.f32.xlu1 %v4168_v1  ;;  %v4165_v2 = vsel %vm126_vm0, %v4159_v0, 0.0  ;;  %v4397_v1 = vld [vmem:[%s6227_s19] sm:$0xff] }
0x1f71   :  { %4166 = vadd.xlane.f32.xlu0 %v4165_v2  ;;  %5243 = vmatpush3.msra.mxu0 %v4397_v1  ;;  %v4781_v2 = vld [vmem:[%s6228_s18] ss:$0 sm:$0xff] }
0x1f72   :  { %5252 = vmatprep.subr.mxu0 %v5445_v13 }
0x1ffd   :  { %v4170_v4 = vpop.xlane.xlu1 %4169 }
0x1ffe   :  { %v4172_v5 = vmul.f32 0.03125, %v4170_v4  ;;  %v4167_v3 = vpop.xlane.xlu0 %4166 }
0x1fff   :  { %v4171_v6 = vmul.f32 0.03125, %v4167_v3 }
0x2000   :  { %v4174_v7 = vsub.f32 %v4160_v63, %v4172_v5 }
0x2001   :  { %v4173_v9 = vsub.f32 %v4159_v0, %v4171_v6 }
0x2002   :  { %v4176_v10 = vmul.f32 %v4174_v7, %v4174_v7 }
0x2003   :  { %v4175_v12 = vmul.f32 %v4173_v9, %v4173_v9 }
0x2004   :  { %v4180_v11 = vsel %vm126_vm0, %v4176_v10, 0.0 }
0x2005   :  { %4181 = vadd.xlane.f32.xlu1 %v4180_v11  ;;  %v4177_v14 = vsel %vm126_vm0, %v4175_v12, 0.0 }
0x2006   :  { %4178 = vadd.xlane.f32.xlu0 %v4177_v14 }
0x2092   :  { %v4182_v22 = vpop.xlane.xlu1 %4181 }
0x2093   :  { %v4184_v8 = vmul.f32 0.03125, %v4182_v22  ;;  %v4179_v23 = vpop.xlane.xlu0 %4178 }
0x2094   :  { %v4183_v24 = vmul.f32 0.03125, %v4179_v23 }
0x2095   :  { %v4186_v25 = vadd.f32 1e-05, %v4184_v8 }
0x2096   :  { %v4185_v26 = vadd.f32 1e-05, %v4183_v24 }
0x2097   :  { %5437 = vrsqrt.f32 %v4186_v25 }
0x2098   :  { %5439 = vrsqrt.f32 %v4185_v26 }
0x20a1   :  { %v5438_v27 = vpop.eup %5437 }
0x20a2   :  { %v5440_v29 = vpop.eup %5439  ;;  %v4190_v30 = vmul.f32 %v5438_v27, %v4174_v7  ;;  %v4479_v7 = vld [vmem:[%s6229_s21] sm:$0xff] }
0x20a3   :  { %v4189_v32 = vmul.f32 %v5440_v29, %v4173_v9  ;;  %v4783_v9 = vld [vmem:[%s6230_s20] ss:$0 sm:$0xff] }
0x20a4   :  { %v4198_v33 = vmul.f32 %v4777_v28, %v4190_v30 }
0x20a5   :  { %v4197_v37 = vmul.f32 %v4777_v28, %v4189_v32 }
0x20a6   :  { %v4206_v38 = vadd.f32 %v4778_v31, %v4198_v33 }
0x20a7   :  { %v4205_v41 = vadd.f32 %v4778_v31, %v4197_v37 }
0x20a8   :  { %v4214_v43 = vsel %vm126_vm0, %v4206_v38, 0.0 }
0x20a9   :  { %v4207_v44 = vsel %vm126_vm0, %v4205_v41, 0.0  ;;  %v4215_v45 = vrot.slane %v4214_v43, 4 }
0x20aa   :  { %v4208_v46 = vrot.slane %v4207_v44, 4 }
0x20ab   :  { %v4216_v35 = vadd.f32 %v4215_v45, %v4214_v43 }
0x20ac   :  { %v4209_v47 = vadd.f32 %v4208_v46, %v4207_v44 }
0x20ad   :  { %v4217_v48 = vrot.slane %v4216_v35, 2 }
0x20ae   :  { %v4210_v49 = vrot.slane %v4209_v47, 2 }
0x20af   :  { %v4218_v17 = vadd.f32 %v4217_v48, %v4216_v35 }
0x20b0   :  { %v4211_v50 = vadd.f32 %v4210_v49, %v4209_v47 }
0x20b1   :  { %v4219_v51 = vrot.slane %v4218_v17, 1 }
0x20b2   :  { %v4212_v40 = vrot.slane %v4211_v50, 1 }
0x20b3   :  { %v4220_v52 = vadd.f32 %v4219_v51, %v4218_v17 }
0x20b4   :  { %v4213_v42 = vadd.f32 %v4212_v40, %v4211_v50 }
0x20b5   :  { %v4223_v55 = vmul.f32 0.125, %v4220_v52 }
0x20b6   :  { %v4222_v56 = vmul.f32 0.125, %v4213_v42 }
0x20b8   :  { %v4238_v57 = vsel %vm4237_vm5, %v4223_v55, %v4222_v56 }
0x20b9   :  { %5229 = vmatmul.mubr.msk.f32.vlgmr.msra.gmra.mrb[46].mxu1 %vm126_vm0, %v4238_v57 }
0x20ba   :  { %5329 = vmatpush3.bf16.msra.mxu1 %v5328_v18  ;;  %5239 = vmatprep.mubr.msk.f32.mxu1 %vm5446_vm1, %v5445_v13 }
0x20bb   :  { %5330 = vmatprep.subr.bf16.mxu1 %v5460_v15  ;;  %v30_v15 = vstv %s6232_s24 }
0x20bc   :  { %31 = vst [vmem:[#allocation2] sm:$0x1] %v30_v15 }
0x20be   :  { %5332 = vmatpush3.bf16.msra.mxu1 %v5331_v60 }
0x20bf   :  { %5247 = vmatprep.subr.mxu1 %v5445_v13 }
0x20c3   :  { %v4787_v21 = vld [vmem:[#allocation2] ss:$0 sm:$0xff] }
0x218c   :  { %v4307_v61 = vpop.f32.mrb[46].mxu1 }
0x218d   :  { %v4308_v62 = vadd.f32 %v4779_v39, %v4307_v61  ;;  %v5230_v63 = vpop.f32.mrb[47].mxu1 }
0x218f   :  { %v4311_v0 = vmax.f32 %v4308_v62, 0.0 }
0x2191   :  { %5240 = vmatmul.mubr.msk.f32.vlgmr.msra.gmra.mrb[48].mxu1 %vm126_vm0, %v4311_v0 }
0x2192   :  { %5249 = vmatprep.mubr.msk.f32.mxu1 %vm5446_vm1, %v5445_v13  ;;  %5248 = vmatpush3.msra.mxu1 %v4479_v7 }
0x2264   :  { %v4392_v4 = vpop.f32.mrb[48].mxu1 }
0x2265   :  { %v4393_v5 = vadd.f32 %v4781_v2, %v4392_v4  ;;  %v5241_v3 = vpop.f32.mrb[49].mxu1 }
0x2267   :  { %v4396_v6 = vmax.f32 %v4393_v5, 0.0 }
0x2269   :  { %5245 = vmatmul.mubr.msk.f32.vlgmr.msra.gmra.mrb[34].mxu0 %vm225_vm2, %v4396_v6 }
0x226a   :  { %5254 = vmatprep.mubr.msk.f32.mxu0 %vm5446_vm1, %v5445_v13  ;;  %v4561_v13 = vld [vmem:[%s6231_s23] sm:$0xf]  ;;  %s6297_s23 = sld [smem:[#allocation13_spill]] }
0x226b   :  { %5253 = vmatpush3.msk.msra.mxu0 %vm4573_vm6, %v4561_v13 }
0x233c   :  { %v4474_v10 = vpop.f32.mrb[34].mxu0 }
0x233d   :  { %v4475_v12 = vadd.f32 %v4783_v9, %v4474_v10  ;;  %v5246_v11 = vpop.f32.mrb[35].mxu0 }
0x233f   :  { %v4478_v14 = vmax.f32 %v4475_v12, 0.0 }
0x2341   :  { %5250 = vmatmul.mubr.msk.f32.vlgmr.msra.gmra.mrb[50].mxu1 %vm225_vm2, %v4478_v14 }
0x2414   :  { %v4556_v36 = vpop.f32.mrb[50].mxu1 }
0x2415   :  { %v4557_v34 = vadd.f32 %v4785_v16, %v4556_v36  ;;  %v5251_v19 = vpop.f32.mrb[51].mxu1 }
0x2417   :  { %v4560_v20 = vmax.f32 %v4557_v34, 0.0 }
0x2419   :  { %5255 = vmatmul.mubr.msk.f32.vlgmr.msra.gmra.mrb[36].mxu0 %vm4569_vm7, %v4560_v20 }
0x24ec   :  { %v4643_v22 = vpop.f32.mrb[36].mxu0 }
0x24ed   :  { %v4644_v8 = vadd.f32 %v4787_v21, %v4643_v22  ;;  %v5256_v23 = vpop.f32.mrb[37].mxu0 }
0x24ef   :  { %v4647_v24 = vsub.f32 0.0, %v4644_v8 }
0x24f1   :  { %v4648_v25 = vmul.f32 1.442695, %v4647_v24 }
0x24f3   :  { %5441 = vpow2.f32 %v4648_v25 }
0x24fd   :  { %v5442_v26 = vpop.eup %5441 }
0x24fe   :  { %v4650_v27 = vadd.f32 1.0, %v5442_v26 }
0x2500   :  { %5443 = vrcp.f32 %v4650_v27 }
0x250a   :  { %v5444_v28 = vpop.eup %5443 }
0x250b   :  { %4654 = vst.msk [vmem:[%s6297_s23] sm:$0x3] %vm4653_vm8, %v5444_v28 }

</bundles_post_ra>
